<compile_context>
chip_gen: v7x
topology: tpu7x:2x2x1
jax: 0.10.0
libtpu: 0.0.40
codegen_flags: <defaults>
</compile_context>

<pallas_src>
import functools

import jax
import jax.numpy as jnp
from jax.experimental import pallas as pl
from jax.experimental.pallas import tpu as pltpu


# -----------------------------------------------------------------------------
# Kernel 1: ConvTranspose2d(in=C, out=C, kernel_size=2, stride=2).
# Because kernel_size == stride there is no tap overlap, so the whole op is one
# per-pixel matmul  x[n,i,j,:] @ Wt  (Wt packs (ki,kj,co) into the output dim),
# followed by a depth-to-space rearrangement done in the wrapper.
# -----------------------------------------------------------------------------
def _upconv2x2_kernel(x_ref, w_ref, b_ref, o_ref):
    x = x_ref[...].astype(jnp.bfloat16)                       # (1, h, w, C)
    y = jax.lax.dot_general(                                   # MXU, f32 accumulate
        x, w_ref[...],
        dimension_numbers=(((3,), (0,)), ((), ())),
        preferred_element_type=jnp.float32)
    o_ref[...] = (y + b_ref[...]).astype(o_ref.dtype)          # bias, f32 epilogue


def upconv2x2(x_nhwc, w_mat, b4):
    """ConvTranspose2d(C, C, 2, 2) in NHWC. w_mat: (C, 4C) bf16, b4: (1, 4C) f32."""
    N, h, w, C = x_nhwc.shape
    C4 = 4 * C
    y = pl.pallas_call(
        _upconv2x2_kernel,
        out_shape=jax.ShapeDtypeStruct((N, h, w, C4), x_nhwc.dtype),
        grid=(N,),
        in_specs=[
            pl.BlockSpec((1, h, w, C), lambda n: (n, 0, 0, 0)),
            pl.BlockSpec((C, C4), lambda n: (0, 0)),           # weights stay resident
            pl.BlockSpec((1, C4), lambda n: (0, 0)),
        ],
        out_specs=pl.BlockSpec((1, h, w, C4), lambda n: (n, 0, 0, 0)),
        compiler_params=pltpu.CompilerParams(
            dimension_semantics=("parallel",),
            vmem_limit_bytes=32 * 1024 * 1024),
    )(x_nhwc, w_mat, b4)
    # depth-to-space: packed channel index is (ki, kj, co) -> out[2i+ki, 2j+kj, co]
    y = y.reshape(N, h, w, 2, 2, C).transpose(0, 1, 3, 2, 4, 5)
    return y.reshape(N, 2 * h, 2 * w, C)


# -----------------------------------------------------------------------------
# Kernel 2: fused DoubleConv.
#   conv1(im2col matmul) + bias + LeakyReLU  ->  VMEM scratch (with conv2's zero
#   padding and the row halo)  ->  conv2(im2col matmul) + bias + LeakyReLU.
# Grid = (batch, H/TH row tiles).  The padded input block is constant over the
# row axis, so Pallas keeps it resident and only the output tiles stream out.
# Row-halo rows of the layer-1 output that fall outside the image are masked to
# zero (they correspond to conv2's zero padding, not to conv1 outputs).
# -----------------------------------------------------------------------------
def _double_conv_kernel(x_ref, w1_ref, b1_ref, w2_ref, b2_ref, o_ref, l1_ref, *,
                        H, W, TH, KH, KW, pad, slope):
    THL = TH + 2 * pad                                    # layer-1 rows incl. conv2 halo
    r0 = pl.multiple_of(pl.program_id(1) * TH, TH)        # first output row of this tile

    # ---------------- conv1 on layer-1 rows [r0-pad, r0+TH+pad) ----------------
    # x_ref holds the input padded by 2*pad rows / pad cols; the slab below starts
    # at padded-row r0 and covers THL + 2*pad rows.
    xs = x_ref[0, pl.ds(r0, THL + 2 * pad), :, :]                       # (THL+2p, W+2p, C1)
    taps1 = [xs[kh:kh + THL, kw:kw + W, :]
             for kh in range(KH) for kw in range(KW)]
    patches1 = jnp.concatenate(taps1, axis=-1).astype(jnp.bfloat16)     # (THL, W, K*K*C1)
    l1 = jax.lax.dot_general(                                           # one big MXU matmul
        patches1, w1_ref[...],
        dimension_numbers=(((2,), (0,)), ((), ())),
        preferred_element_type=jnp.float32)
    l1 = l1 + b1_ref[...]                                               # folded-BN bias
    l1 = jnp.where(l1 > 0, l1, slope * l1)                              # LeakyReLU (f32)

    # zero the halo rows lying outside the image (= conv2's zero padding).
    row = r0 - pad + jax.lax.broadcasted_iota(jnp.int32, (THL, 1, 1), 0)
    l1 = jnp.where(jnp.logical_and(row >= 0, row < H), l1, 0.0)

    # ------------- conv2 reads the intermediate from VMEM scratch --------------
    l1_ref[...] = jnp.zeros(l1_ref.shape, l1_ref.dtype)                 # zero-padded cols
    l1_ref[:, pad:pad + W, :] = l1
    taps2 = [l1_ref[kh:kh + TH, kw:kw + W, :]
             for kh in range(KH) for kw in range(KW)]
    patches2 = jnp.concatenate(taps2, axis=-1).astype(jnp.bfloat16)     # (TH, W, K*K*Cmid)
    y = jax.lax.dot_general(
        patches2, w2_ref[...],
        dimension_numbers=(((2,), (0,)), ((), ())),
        preferred_element_type=jnp.float32)
    y = y + b2_ref[...]
    y = jnp.where(y > 0, y, slope * y)

    o_ref[...] = y[None].astype(o_ref.dtype)                            # (1, TH, W, Cout)


def fused_double_conv(x_nhwc, w1_mat, b1, w2_mat, b2, *, patch, pad, slope, row_tile):
    N, H, W, C1 = x_nhwc.shape
    Cmid = w1_mat.shape[1]
    Cout = w2_mat.shape[1]
    KH = KW = patch
    assert w1_mat.shape[0] == KH * KW * C1 and w2_mat.shape[0] == KH * KW * Cmid
    assert patch == 2 * pad + 1, "fused row-halo scheme assumes 'same' convolutions"

    TH = row_tile if (H % row_tile == 0) else H            # row-tile height
    THL = TH + 2 * pad
    # rows padded by 2*pad (conv1 zero pad + conv2 halo), cols padded by pad.
    # TODO(synk): the boundary zero-pad could be folded into in-kernel masking to
    #             avoid this (small) extra HBM copy.
    xp = jnp.pad(x_nhwc, ((0, 0), (2 * pad, 2 * pad), (pad, pad), (0, 0)))
    Hp, Wp = H + 4 * pad, W + 2 * pad

    kernel = functools.partial(_double_conv_kernel, H=H, W=W, TH=TH,
                               KH=KH, KW=KW, pad=pad, slope=slope)
    return pl.pallas_call(
        kernel,
        out_shape=jax.ShapeDtypeStruct((N, H, W, Cout), x_nhwc.dtype),
        grid=(N, H // TH),
        in_specs=[
            # whole padded image per batch element; constant over the row axis so
            # Pallas keeps it resident in VMEM across the row tiles (no re-DMA).
            pl.BlockSpec((1, Hp, Wp, C1), lambda n, r: (n, 0, 0, 0)),
            pl.BlockSpec((KH * KW * C1, Cmid), lambda n, r: (0, 0)),
            pl.BlockSpec((1, Cmid), lambda n, r: (0, 0)),
            pl.BlockSpec((KH * KW * Cmid, Cout), lambda n, r: (0, 0)),
            pl.BlockSpec((1, Cout), lambda n, r: (0, 0)),
        ],
        out_specs=pl.BlockSpec((1, TH, W, Cout), lambda n, r: (n, r, 0, 0)),
        scratch_shapes=[pltpu.VMEM((THL, W + 2 * pad, Cmid), jnp.float32)],
        compiler_params=pltpu.CompilerParams(
            dimension_semantics=("parallel", "parallel"),
            vmem_limit_bytes=32 * 1024 * 1024),
    )(xp, w1_mat, b1, w2_mat, b2)


# -----------------------------------------------------------------------------
# Parameters (synthetic, deterministic; shapes/layout match the PyTorch module).
# -----------------------------------------------------------------------------
def make_upconv_params(key, n_ch_in, n_ch_out, patch, eps=1e-5):
    C, Cin1, Cout = n_ch_in, 2 * n_ch_in, n_ch_out
    ks = jax.random.split(key, 8)

    # ConvTranspose2d(C, C, 2, 2): PyTorch weight (C_in, C_out, 2, 2), bias (C_out,)
    up_w = jax.random.normal(ks[0], (C, C, 2, 2), jnp.float32) * 0.1
    up_b = 0.1 * jax.random.normal(ks[1], (C,), jnp.float32)
    # Conv2d weights, PyTorch OIHW layout (bias=False).
    w1_oihw = jax.random.normal(ks[2], (Cout, Cin1, patch, patch), jnp.float32) * 0.1
    w2_oihw = jax.random.normal(ks[3], (Cout, Cout, patch, patch), jnp.float32) * 0.1
    # BatchNorm params; running_mean=0, running_var=1 at init (eval mode).
    gamma1 = 1.0 + 0.1 * jax.random.normal(ks[4], (Cout,), jnp.float32)
    beta1 = 0.1 * jax.random.normal(ks[5], (Cout,), jnp.float32)
    gamma2 = 1.0 + 0.1 * jax.random.normal(ks[6], (Cout,), jnp.float32)
    beta2 = 0.1 * jax.random.normal(ks[7], (Cout,), jnp.float32)
    run_mean = jnp.zeros((Cout,), jnp.float32)
    run_var = jnp.ones((Cout,), jnp.float32)

    def fold(w_oihw, gamma, beta, mean, var):
        scale = gamma / jnp.sqrt(var + eps)
        bias = beta - mean * scale
        w_hwio = jnp.transpose(w_oihw, (2, 3, 1, 0))            # OIHW -> HWIO
        w_folded = w_hwio * scale[None, None, None, :]          # fold BN scale into conv
        kh, kw, cin, cout = w_folded.shape
        return (w_folded.reshape(kh * kw * cin, cout).astype(jnp.bfloat16),
                bias.reshape(1, cout))

    w1_mat, b1 = fold(w1_oihw, gamma1, beta1, run_mean, run_var)
    w2_mat, b2 = fold(w2_oihw, gamma2, beta2, run_mean, run_var)

    # Pack transposed-conv weight: Wt[ci, ki*2C + kj*C + co] = up_w[ci, co, ki, kj]
    up_w_mat = jnp.transpose(up_w, (0, 2, 3, 1)).reshape(C, 4 * C).astype(jnp.bfloat16)
    up_b4 = jnp.tile(up_b, 4).reshape(1, 4 * C)                 # bias per (ki,kj,co) slot

    return dict(up_w_mat=up_w_mat, up_b4=up_b4,
                w1_mat=w1_mat, b1=b1, w2_mat=w2_mat, b2=b2)


# -----------------------------------------------------------------------------
# Full UpConv forward (NCHW in / NCHW out, matching PyTorch).
# -----------------------------------------------------------------------------
@functools.partial(jax.jit, static_argnames=("patch", "pad", "slope", "row_tile"))
def up_conv_forward(x1_nchw, x2_nchw, params, *, patch, pad, slope, row_tile=8):
    x1 = jnp.transpose(x1_nchw, (0, 2, 3, 1))                   # NCHW -> NHWC
    x2 = jnp.transpose(x2_nchw, (0, 2, 3, 1))
    up = upconv2x2(x1, params["up_w_mat"], params["up_b4"])     # (N, 2h, 2w, C)
    x = jnp.concatenate([up, x2], axis=-1)                      # torch.cat((up, x2), dim=1)
    # Dropout2d(p): identity in eval mode.
    y = fused_double_conv(x, params["w1_mat"], params["b1"],
                          params["w2_mat"], params["b2"],
                          patch=patch, pad=pad, slope=slope, row_tile=row_tile)
    return jnp.transpose(y, (0, 3, 1, 2))                       # NHWC -> NCHW


# -----------------------------------------------------------------------------
# Pure-JAX reference (f32) for a correctness check of the Pallas path.
# -----------------------------------------------------------------------------
def _reference_forward(x1_nchw, x2_nchw, params, *, patch, pad, slope):
    hi = jax.lax.Precision.HIGHEST
    x1 = jnp.transpose(x1_nchw, (0, 2, 3, 1))
    x2 = jnp.transpose(x2_nchw, (0, 2, 3, 1))
    N, h, w, C = x1.shape
    wt = params["up_w_mat"].astype(jnp.float32)
    up = jnp.einsum("nhwc,ck->nhwk", x1, wt, precision=hi) + params["up_b4"]
    up = up.reshape(N, h, w, 2, 2, C).transpose(0, 1, 3, 2, 4, 5).reshape(N, 2 * h, 2 * w, C)
    x = jnp.concatenate([up, x2], axis=-1)

    def conv_bn_lrelu(x, w_mat, b):
        Nn, H, W, Cin = x.shape
        xp = jnp.pad(x, ((0, 0), (pad, pad), (pad, pad), (0, 0)))
        taps = [xp[:, kh:kh + H, kw:kw + W, :]
                for kh in range(patch) for kw in range(patch)]
        pat = jnp.concatenate(taps, axis=-1)
        y = jnp.einsum("nhwk,kc->nhwc", pat, w_mat.astype(jnp.float32), precision=hi) + b
        return jnp.where(y > 0, y, slope * y)

    y = conv_bn_lrelu(x, params["w1_mat"], params["b1"])
    y = conv_bn_lrelu(y, params["w2_mat"], params["b2"])
    return jnp.transpose(y, (0, 3, 1, 2))


if __name__ == "__main__":
    # Module hyper-params (small, consistent with the PyTorch module signature).
    n_ch_in, n_ch_out = 4, 8
    n_convpatch, n_convpad = 3, 1
    lrelu_slope = 0.1
    dp_rate = 0.25  # Dropout2d: identity in eval mode (unused)

    key = jax.random.PRNGKey(0)
    k1, k2, kp = jax.random.split(key, 3)
    # UpConv forward: x1 = low-res feature map, x2 = skip connection (NCHW like PyTorch).
    x1 = jax.random.normal(k1, (2, n_ch_in, 8, 8), jnp.float32)
    x2 = jax.random.normal(k2, (2, n_ch_in, 16, 16), jnp.float32)
    params = make_upconv_params(kp, n_ch_in, n_ch_out, n_convpatch)

    out = up_conv_forward(x1, x2, params, patch=n_convpatch, pad=n_convpad,
                          slope=lrelu_slope, row_tile=8)
    out = jax.block_until_ready(out)
    assert out.shape == (2, n_ch_out, 16, 16), out.shape

    ref = _reference_forward(x1, x2, params, patch=n_convpatch, pad=n_convpad,
                             slope=lrelu_slope)
    assert bool(jnp.allclose(out, ref, rtol=0.1, atol=0.1)), \
        float(jnp.max(jnp.abs(out - ref)))
    print("KERNEL_OK")
</pallas_src>

<mosaic_0001>
module attributes {stable_mosaic.version = 11 : i64} {
  func.func @_upconv2x2_kernel(%arg0: i32, %arg1: memref<1x8x8x4xf32, #tpu.memory_space<vmem>>, %arg2: memref<4x16xbf16, #tpu.memory_space<vmem>>, %arg3: memref<1x16xf32, #tpu.memory_space<vmem>>, %arg4: memref<1x8x8x16xf32, #tpu.memory_space<vmem>>) attributes {dimension_semantics = [#tpu.dimension_semantics<parallel>], iteration_bounds = array<i64: 2>, scalar_prefetch = 0 : i64, scratch_operands = 0 : i64, tpu.core_type = #tpu.core_type<tc>, window_params = [{transform_indices = @transform_0, window_bounds = array<i64: 1, 8, 8, 4>}, {pipeline_mode = #tpu.pipeline_mode<synchronous>, transform_indices = @transform_1, window_bounds = array<i64: 4, 16>}, {pipeline_mode = #tpu.pipeline_mode<synchronous>, transform_indices = @transform_2, window_bounds = array<i64: 1, 16>}, {transform_indices = @transform_3, window_bounds = array<i64: 1, 8, 8, 16>}]} {
    %c0 = arith.constant 0 : index
    %c0_0 = arith.constant 0 : index
    %c0_1 = arith.constant 0 : index
    %c0_2 = arith.constant 0 : index
    %0 = vector.load %arg1[%c0, %c0_0, %c0_1, %c0_2] : memref<1x8x8x4xf32, #tpu.memory_space<vmem>>, vector<1x8x8x4xf32>
    %1 = arith.truncf %0 : vector<1x8x8x4xf32> to vector<1x8x8x4xbf16>
    %c0_3 = arith.constant 0 : index
    %c0_4 = arith.constant 0 : index
    %2 = vector.load %arg2[%c0_3, %c0_4] : memref<4x16xbf16, #tpu.memory_space<vmem>>, vector<4x16xbf16>
    %cst = arith.constant dense<0.000000e+00> : vector<1x8x8x16xf32>
    %3 = tpu.matmul %1, %2, %cst {dimension_numbers = #tpu.dot_dimension_numbers<[3], [0], [0, 1, 2], [1], [0, 0, 0, 1, 0, 2, 1, 1], [], []>} : vector<1x8x8x4xbf16>, vector<4x16xbf16>, vector<1x8x8x16xf32> -> vector<1x8x8x16xf32>
    %c0_5 = arith.constant 0 : index
    %c0_6 = arith.constant 0 : index
    %4 = vector.load %arg3[%c0_5, %c0_6] : memref<1x16xf32, #tpu.memory_space<vmem>>, vector<1x16xf32>
    %5 = vector.shape_cast %4 : vector<1x16xf32> to vector<1x1x1x16xf32>
    %6 = vector.broadcast %5 : vector<1x1x1x16xf32> to vector<1x8x8x16xf32>
    %7 = arith.addf %3, %6 : vector<1x8x8x16xf32>
    %c0_7 = arith.constant 0 : index
    %c0_8 = arith.constant 0 : index
    %c0_9 = arith.constant 0 : index
    %c0_10 = arith.constant 0 : index
    %8 = vector.load %arg4[%c0_7, %c0_8, %c0_9, %c0_10] : memref<1x8x8x16xf32, #tpu.memory_space<vmem>>, vector<1x8x8x16xf32>
    tpu.vector_store %arg4[%c0_7, %c0_8, %c0_9, %c0_10], %7 {strides = array<i32>} : memref<1x8x8x16xf32, #tpu.memory_space<vmem>>, vector<1x8x8x16xf32>,
    return
  }
  func.func @transform_0(%arg0: i32) -> (i32, i32, i32, i32) {
    %c0_i32 = arith.constant 0 : i32
    %c0_i32_0 = arith.constant 0 : i32
    %c0_i32_1 = arith.constant 0 : i32
    %c0_i32_2 = arith.constant 0 : i32
    return %arg0, %c0_i32, %c0_i32_0, %c0_i32_1 : i32, i32, i32, i32
  }
  func.func @transform_1(%arg0: i32) -> (i32, i32) {
    %c0_i32 = arith.constant 0 : i32
    %c0_i32_0 = arith.constant 0 : i32
    %c0_i32_1 = arith.constant 0 : i32
    return %c0_i32, %c0_i32_0 : i32, i32
  }
  func.func @transform_2(%arg0: i32) -> (i32, i32) {
    %c0_i32 = arith.constant 0 : i32
    %c0_i32_0 = arith.constant 0 : i32
    %c0_i32_1 = arith.constant 0 : i32
    return %c0_i32, %c0_i32_0 : i32, i32
  }
  func.func @transform_3(%arg0: i32) -> (i32, i32, i32, i32) {
    %c0_i32 = arith.constant 0 : i32
    %c0_i32_0 = arith.constant 0 : i32
    %c0_i32_1 = arith.constant 0 : i32
    %c0_i32_2 = arith.constant 0 : i32
    return %arg0, %c0_i32, %c0_i32_0, %c0_i32_1 : i32, i32, i32, i32
  }
}

module attributes {stable_mosaic.version = 11 : i64} {
  func.func @_double_conv_kernel(%arg0: i32, %arg1: i32, %arg2: memref<1x20x18x8xf32, #tpu.memory_space<vmem>>, %arg3: memref<72x8xbf16, #tpu.memory_space<vmem>>, %arg4: memref<1x8xf32, #tpu.memory_space<vmem>>, %arg5: memref<72x8xbf16, #tpu.memory_space<vmem>>, %arg6: memref<1x8xf32, #tpu.memory_space<vmem>>, %arg7: memref<1x8x16x8xf32, #tpu.memory_space<vmem>>, %arg8: memref<10x18x8xf32, #tpu.memory_space<vmem>>) attributes {dimension_semantics = [#tpu.dimension_semantics<parallel>, #tpu.dimension_semantics<parallel>], iteration_bounds = array<i64: 2, 2>, scalar_prefetch = 0 : i64, scratch_operands = 1 : i64, tpu.core_type = #tpu.core_type<tc>, window_params = [{transform_indices = @transform_0, window_bounds = array<i64: 1, 20, 18, 8>}, {pipeline_mode = #tpu.pipeline_mode<synchronous>, transform_indices = @transform_1, window_bounds = array<i64: 72, 8>}, {pipeline_mode = #tpu.pipeline_mode<synchronous>, transform_indices = @transform_2, window_bounds = array<i64: 1, 8>}, {pipeline_mode = #tpu.pipeline_mode<synchronous>, transform_indices = @transform_3, window_bounds = array<i64: 72, 8>}, {pipeline_mode = #tpu.pipeline_mode<synchronous>, transform_indices = @transform_4, window_bounds = array<i64: 1, 8>}, {transform_indices = @transform_5, window_bounds = array<i64: 1, 8, 16, 8>}]} {
    %c8_i32 = arith.constant 8 : i32
    %0 = arith.muli %arg1, %c8_i32 : i32
    %1 = tpu.assume_multiple %0, 8 : i32
    %c0 = arith.constant 0 : index
    %2 = arith.index_cast %1 : i32 to index
    %c0_0 = arith.constant 0 : index
    %c0_1 = arith.constant 0 : index
    %3 = vector.load %arg2[%c0, %2, %c0_0, %c0_1] : memref<1x20x18x8xf32, #tpu.memory_space<vmem>>, vector<1x12x18x8xf32>
    %4 = vector.shape_cast %3 : vector<1x12x18x8xf32> to vector<12x18x8xf32>
    %5 = vector.extract_strided_slice %4 {offsets = [0, 0, 0], sizes = [10, 16, 8], strides = [1, 1, 1]} : vector<12x18x8xf32> to vector<10x16x8xf32>
    %6 = vector.extract_strided_slice %4 {offsets = [0, 1, 0], sizes = [10, 16, 8], strides = [1, 1, 1]} : vector<12x18x8xf32> to vector<10x16x8xf32>
    %7 = vector.extract_strided_slice %4 {offsets = [0, 2, 0], sizes = [10, 16, 8], strides = [1, 1, 1]} : vector<12x18x8xf32> to vector<10x16x8xf32>
    %8 = vector.extract_strided_slice %4 {offsets = [1, 0, 0], sizes = [10, 16, 8], strides = [1, 1, 1]} : vector<12x18x8xf32> to vector<10x16x8xf32>
    %9 = vector.extract_strided_slice %4 {offsets = [1, 1, 0], sizes = [10, 16, 8], strides = [1, 1, 1]} : vector<12x18x8xf32> to vector<10x16x8xf32>
    %10 = vector.extract_strided_slice %4 {offsets = [1, 2, 0], sizes = [10, 16, 8], strides = [1, 1, 1]} : vector<12x18x8xf32> to vector<10x16x8xf32>
    %11 = vector.extract_strided_slice %4 {offsets = [2, 0, 0], sizes = [10, 16, 8], strides = [1, 1, 1]} : vector<12x18x8xf32> to vector<10x16x8xf32>
    %12 = vector.extract_strided_slice %4 {offsets = [2, 1, 0], sizes = [10, 16, 8], strides = [1, 1, 1]} : vector<12x18x8xf32> to vector<10x16x8xf32>
    %13 = vector.extract_strided_slice %4 {offsets = [2, 2, 0], sizes = [10, 16, 8], strides = [1, 1, 1]} : vector<12x18x8xf32> to vector<10x16x8xf32>
    %14 = tpu.concatenate %5, %6, %7, %8, %9, %10, %11, %12, %13 in 2 : vector<10x16x8xf32>, vector<10x16x8xf32>, vector<10x16x8xf32>, vector<10x16x8xf32>, vector<10x16x8xf32>, vector<10x16x8xf32>, vector<10x16x8xf32>, vector<10x16x8xf32>, vector<10x16x8xf32> -> vector<10x16x72xf32>
    %15 = arith.truncf %14 : vector<10x16x72xf32> to vector<10x16x72xbf16>
    %c0_2 = arith.constant 0 : index
    %c0_3 = arith.constant 0 : index
    %16 = vector.load %arg3[%c0_2, %c0_3] : memref<72x8xbf16, #tpu.memory_space<vmem>>, vector<72x8xbf16>
    %cst = arith.constant dense<0.000000e+00> : vector<10x16x8xf32>
    %17 = tpu.matmul %15, %16, %cst {dimension_numbers = #tpu.dot_dimension_numbers<[2], [0], [0, 1], [1], [0, 0, 0, 1, 1, 1], [], []>} : vector<10x16x72xbf16>, vector<72x8xbf16>, vector<10x16x8xf32> -> vector<10x16x8xf32>
    %c0_4 = arith.constant 0 : index
    %c0_5 = arith.constant 0 : index
    %18 = vector.load %arg4[%c0_4, %c0_5] : memref<1x8xf32, #tpu.memory_space<vmem>>, vector<1x8xf32>
    %19 = vector.shape_cast %18 : vector<1x8xf32> to vector<1x1x8xf32>
    %20 = vector.broadcast %19 : vector<1x1x8xf32> to vector<10x16x8xf32>
    %21 = arith.addf %17, %20 : vector<10x16x8xf32>
    %cst_6 = arith.constant 0.000000e+00 : f32
    %22 = vector.broadcast %cst_6 : f32 to vector<10x16x8xf32>
    %23 = arith.cmpf ogt, %21, %22 : vector<10x16x8xf32>
    %cst_7 = arith.constant 1.000000e-01 : f32
    %24 = vector.broadcast %cst_7 : f32 to vector<10x16x8xf32>
    %25 = arith.mulf %24, %21 : vector<10x16x8xf32>
    %26 = arith.select %23, %21, %25 : vector<10x16x8xi1>, vector<10x16x8xf32>
    %c1_i32 = arith.constant 1 : i32
    %27 = arith.subi %1, %c1_i32 : i32
    %28 = tpu.iota {dimensions = array<i32: 0>} : vector<10x1x1xi32>
    %29 = vector.broadcast %27 : i32 to vector<10x1x1xi32>
    %30 = arith.addi %29, %28 : vector<10x1x1xi32>
    %c0_i32 = arith.constant 0 : i32
    %31 = vector.broadcast %c0_i32 : i32 to vector<10x1x1xi32>
    %32 = arith.cmpi sge, %30, %31 : vector<10x1x1xi32>
    %c16_i32 = arith.constant 16 : i32
    %33 = vector.broadcast %c16_i32 : i32 to vector<10x1x1xi32>
    %34 = arith.cmpi slt, %30, %33 : vector<10x1x1xi32>
    %35 = arith.andi %32, %34 : vector<10x1x1xi1>
    %cst_8 = arith.constant 0.000000e+00 : f32
    %36 = vector.shape_cast %35 : vector<10x1x1xi1> to vector<10x1x1xi1>
    %37 = vector.broadcast %36 : vector<10x1x1xi1> to vector<10x16x8xi1>
    %38 = vector.broadcast %cst_8 : f32 to vector<10x16x8xf32>
    %39 = arith.select %37, %26, %38 : vector<10x16x8xi1>, vector<10x16x8xf32>
    %cst_9 = arith.constant 0.000000e+00 : f32
    %40 = vector.broadcast %cst_9 : f32 to vector<10x18x8xf32>
    %c0_10 = arith.constant 0 : index
    %c0_11 = arith.constant 0 : index
    %c0_12 = arith.constant 0 : index
    %41 = vector.load %arg8[%c0_10, %c0_11, %c0_12] : memref<10x18x8xf32, #tpu.memory_space<vmem>>, vector<10x18x8xf32>
    tpu.vector_store %arg8[%c0_10, %c0_11, %c0_12], %40 {strides = array<i32>} : memref<10x18x8xf32, #tpu.memory_space<vmem>>, vector<10x18x8xf32>,
    %c0_13 = arith.constant 0 : index
    %c1 = arith.constant 1 : index
    %c0_14 = arith.constant 0 : index
    %42 = vector.load %arg8[%c0_13, %c1, %c0_14] : memref<10x18x8xf32, #tpu.memory_space<vmem>>, vector<10x16x8xf32>
    tpu.vector_store %arg8[%c0_13, %c1, %c0_14], %39 {strides = array<i32>} : memref<10x18x8xf32, #tpu.memory_space<vmem>>, vector<10x16x8xf32>,
    %c0_15 = arith.constant 0 : index
    %c0_16 = arith.constant 0 : index
    %c0_17 = arith.constant 0 : index
    %43 = vector.load %arg8[%c0_15, %c0_16, %c0_17] : memref<10x18x8xf32, #tpu.memory_space<vmem>>, vector<8x16x8xf32>
    %c0_18 = arith.constant 0 : index
    %c1_19 = arith.constant 1 : index
    %c0_20 = arith.constant 0 : index
    %44 = vector.load %arg8[%c0_18, %c1_19, %c0_20] : memref<10x18x8xf32, #tpu.memory_space<vmem>>, vector<8x16x8xf32>
    %c0_21 = arith.constant 0 : index
    %c2 = arith.constant 2 : index
    %c0_22 = arith.constant 0 : index
    %45 = vector.load %arg8[%c0_21, %c2, %c0_22] : memref<10x18x8xf32, #tpu.memory_space<vmem>>, vector<8x16x8xf32>
    %c1_23 = arith.constant 1 : index
    %c0_24 = arith.constant 0 : index
    %c0_25 = arith.constant 0 : index
    %46 = vector.load %arg8[%c1_23, %c0_24, %c0_25] : memref<10x18x8xf32, #tpu.memory_space<vmem>>, vector<8x16x8xf32>
    %c1_26 = arith.constant 1 : index
    %c1_27 = arith.constant 1 : index
    %c0_28 = arith.constant 0 : index
    %47 = vector.load %arg8[%c1_26, %c1_27, %c0_28] : memref<10x18x8xf32, #tpu.memory_space<vmem>>, vector<8x16x8xf32>
    %c1_29 = arith.constant 1 : index
    %c2_30 = arith.constant 2 : index
    %c0_31 = arith.constant 0 : index
    %48 = vector.load %arg8[%c1_29, %c2_30, %c0_31] : memref<10x18x8xf32, #tpu.memory_space<vmem>>, vector<8x16x8xf32>
    %c2_32 = arith.constant 2 : index
    %c0_33 = arith.constant 0 : index
    %c0_34 = arith.constant 0 : index
    %49 = vector.load %arg8[%c2_32, %c0_33, %c0_34] : memref<10x18x8xf32, #tpu.memory_space<vmem>>, vector<8x16x8xf32>
    %c2_35 = arith.constant 2 : index
    %c1_36 = arith.constant 1 : index
    %c0_37 = arith.constant 0 : index
    %50 = vector.load %arg8[%c2_35, %c1_36, %c0_37] : memref<10x18x8xf32, #tpu.memory_space<vmem>>, vector<8x16x8xf32>
    %c2_38 = arith.constant 2 : index
    %c2_39 = arith.constant 2 : index
    %c0_40 = arith.constant 0 : index
    %51 = vector.load %arg8[%c2_38, %c2_39, %c0_40] : memref<10x18x8xf32, #tpu.memory_space<vmem>>, vector<8x16x8xf32>
    %52 = tpu.concatenate %43, %44, %45, %46, %47, %48, %49, %50, %51 in 2 : vector<8x16x8xf32>, vector<8x16x8xf32>, vector<8x16x8xf32>, vector<8x16x8xf32>, vector<8x16x8xf32>, vector<8x16x8xf32>, vector<8x16x8xf32>, vector<8x16x8xf32>, vector<8x16x8xf32> -> vector<8x16x72xf32>
    %53 = arith.truncf %52 : vector<8x16x72xf32> to vector<8x16x72xbf16>
    %c0_41 = arith.constant 0 : index
    %c0_42 = arith.constant 0 : index
    %54 = vector.load %arg5[%c0_41, %c0_42] : memref<72x8xbf16, #tpu.memory_space<vmem>>, vector<72x8xbf16>
    %cst_43 = arith.constant dense<0.000000e+00> : vector<8x16x8xf32>
    %55 = tpu.matmul %53, %54, %cst_43 {dimension_numbers = #tpu.dot_dimension_numbers<[2], [0], [0, 1], [1], [0, 0, 0, 1, 1, 1], [], []>} : vector<8x16x72xbf16>, vector<72x8xbf16>, vector<8x16x8xf32> -> vector<8x16x8xf32>
    %c0_44 = arith.constant 0 : index
    %c0_45 = arith.constant 0 : index
    %56 = vector.load %arg6[%c0_44, %c0_45] : memref<1x8xf32, #tpu.memory_space<vmem>>, vector<1x8xf32>
    %57 = vector.shape_cast %56 : vector<1x8xf32> to vector<1x1x8xf32>
    %58 = vector.broadcast %57 : vector<1x1x8xf32> to vector<8x16x8xf32>
    %59 = arith.addf %55, %58 : vector<8x16x8xf32>
    %cst_46 = arith.constant 0.000000e+00 : f32
    %60 = vector.broadcast %cst_46 : f32 to vector<8x16x8xf32>
    %61 = arith.cmpf ogt, %59, %60 : vector<8x16x8xf32>
    %cst_47 = arith.constant 1.000000e-01 : f32
    %62 = vector.broadcast %cst_47 : f32 to vector<8x16x8xf32>
    %63 = arith.mulf %62, %59 : vector<8x16x8xf32>
    %64 = arith.select %61, %59, %63 : vector<8x16x8xi1>, vector<8x16x8xf32>
    %65 = vector.shape_cast %64 : vector<8x16x8xf32> to vector<1x8x16x8xf32>
    %c0_48 = arith.constant 0 : index
    %c0_49 = arith.constant 0 : index
    %c0_50 = arith.constant 0 : index
    %c0_51 = arith.constant 0 : index
    %66 = vector.load %arg7[%c0_48, %c0_49, %c0_50, %c0_51] : memref<1x8x16x8xf32, #tpu.memory_space<vmem>>, vector<1x8x16x8xf32>
    tpu.vector_store %arg7[%c0_48, %c0_49, %c0_50, %c0_51], %65 {strides = array<i32>} : memref<1x8x16x8xf32, #tpu.memory_space<vmem>>, vector<1x8x16x8xf32>,
    return
  }
  func.func @transform_0(%arg0: i32, %arg1: i32) -> (i32, i32, i32, i32) {
    %c0_i32 = arith.constant 0 : i32
    %c0_i32_0 = arith.constant 0 : i32
    %c0_i32_1 = arith.constant 0 : i32
    %c0_i32_2 = arith.constant 0 : i32
    return %arg0, %c0_i32, %c0_i32_0, %c0_i32_1 : i32, i32, i32, i32
  }
  func.func @transform_1(%arg0: i32, %arg1: i32) -> (i32, i32) {
    %c0_i32 = arith.constant 0 : i32
    %c0_i32_0 = arith.constant 0 : i32
    %c0_i32_1 = arith.constant 0 : i32
    return %c0_i32, %c0_i32_0 : i32, i32
  }
  func.func @transform_2(%arg0: i32, %arg1: i32) -> (i32, i32) {
    %c0_i32 = arith.constant 0 : i32
    %c0_i32_0 = arith.constant 0 : i32
    %c0_i32_1 = arith.constant 0 : i32
    return %c0_i32, %c0_i32_0 : i32, i32
  }
  func.func @transform_3(%arg0: i32, %arg1: i32) -> (i32, i32) {
    %c0_i32 = arith.constant 0 : i32
    %c0_i32_0 = arith.constant 0 : i32
    %c0_i32_1 = arith.constant 0 : i32
    return %c0_i32, %c0_i32_0 : i32, i32
  }
  func.func @transform_4(%arg0: i32, %arg1: i32) -> (i32, i32) {
    %c0_i32 = arith.constant 0 : i32
    %c0_i32_0 = arith.constant 0 : i32
    %c0_i32_1 = arith.constant 0 : i32
    return %c0_i32, %c0_i32_0 : i32, i32
  }
  func.func @transform_5(%arg0: i32, %arg1: i32) -> (i32, i32, i32, i32) {
    %c0_i32 = arith.constant 0 : i32
    %c0_i32_0 = arith.constant 0 : i32
    %c0_i32_1 = arith.constant 0 : i32
    return %arg0, %arg1, %c0_i32, %c0_i32_0 : i32, i32, i32, i32
  }
}

</mosaic_0001>

<bundles_post_ra>
// kernel: up_conv_forward.2
= control target key start
LH: loop header
LB: loop body
LE: loop exit
PB: predicated region body
PF: predicated region fallthrough
CT: control target
= control target key end

     0   :  { %s443_s12 = smov 0   ;;  %s474_s0 = inlined_call_operand.vmem [shape: f32[2,8,8,4], index: 0, kind: input, shape index: {}]   ;;  %s475_s1 = inlined_call_operand.vmem [shape: bf16[4,16], index: 1, kind: input, shape index: {}]   ;;  %s476_s2 = inlined_call_operand.vmem [shape: f32[1,16], index: 2, kind: input, shape index: {}]   ;;  %s477_s3 = inlined_call_operand.vmem [shape: f32[2,8,8,16], index: 3, kind: output, shape index: {}]  }
   0x1 LB: > { %s362_s13 = sadd.s32 4294967295, %s421_s12   ;;  %p366_p0 = scmp.ge.s32.totalorder %s421_s12, 1  ;;  %s421_s12 = sphi %s443_s12, %s13_s12  }
   0x2   : > { %p137_p1 = scmp.lt.s32.totalorder %s421_s12, 3 }
   0x4   : > { %p138_p2 = pnand %p366_p0, %p137_p1 }
   0x5   : > { %v188_v0 = vld [vmem:[%s475_s1] sm:$0x3] (!%p138_p2)  ;;  %vm229_vm0 = vcmask (!%p138_p2), 1041408   ;;  %p161_p3 = scmp.lt.s32.totalorder (!%p138_p2), %s362_s13, 1  ;;  %vm216_vm1 = vcmask (!%p138_p2), 31744   ;;  %vm298_vm2 = vcmask (!%p138_p2), 130048  }
   0x6   : > { %141 = sbr.rel (%p138_p2) target bundleno = 239 (0xef), region = 32  ;;  %405 = vmatprep.subr.msk.bf16.mxu0 (!%p138_p2), %vm229_vm0, %v188_v0  ;;  %406 = vmatprep.subr.msk.bf16.mxu1 (!%p138_p2), %vm229_vm0, %v188_v0  ;;  %v231_v1 = vsel (!%p138_p2), %vm229_vm0, %v188_v0, 0  ;;  %v371_v14 = vld [vmem:[%s476_s2] ss:$0 sm:$0xff] (!%p138_p2) }
   0x7   : > { %394 = vmatpush3.bf16.msra.mxu0 (!%p138_p2), %v231_v1  ;;  %404 = vmatpush3.bf16.msra.mxu1 (!%p138_p2), %v231_v1 }
   0xd   : > { %s479_s13 = smov (!%p161_p3, %s362_s13), 1 }
   0xe   : > { %s382_s16 = sshll.u32 %s479_s13, 6 }
   0xf   : > { %s165_s19 = scalar_lea.vmem %s474_s0, %s382_s16  ;;  %s170_s24 = scalar_lea.vmem %s477_s3, %s382_s16 }
  0x10   : > { %v172_v2 = vld [vmem:[%s165_s19] sm:$0xff]  ;;  %v173_v3 = vld [vmem:[%s165_s19 + $0x8] sm:$0xff]  ;;  %v174_v7 = vld [vmem:[%s165_s19 + $0x10] sm:$0xff] }
  0x11   : > { %v176_v4 = vld [vmem:[%s165_s19 + $0x20] sm:$0xff]  ;;  %v384_v5 = vpack.c.bf16 %v173_v3, %v172_v2  ;;  %v177_v6 = vld [vmem:[%s165_s19 + $0x28] sm:$0xff]  ;;  %v175_v8 = vld [vmem:[%s165_s19 + $0x18] sm:$0xff] }
  0x12   : > { %v386_v9 = vpack.c.bf16 %v177_v6, %v176_v4  ;;  %v385_v10 = vpack.c.bf16 %v175_v8, %v174_v7  ;;  %v178_v11 = vld [vmem:[%s165_s19 + $0x30] sm:$0xff]  ;;  %v179_v12 = vld [vmem:[%s165_s19 + $0x38] sm:$0xff] }
  0x13   : > { %395 = vmatprep.mubr.msk.bf16.mxu0 %vm216_vm1, %v384_v5  ;;  %v387_v13 = vpack.c.bf16 %v179_v12, %v178_v11 }
  0x14   : > { %399 = vmatprep.mubr.msk.bf16.mxu1 %vm216_vm1, %v386_v9  ;;  %396 = vmatmul.mubr.msk.bf16.vlgmr.msra.gmra.mrb[0].mxu0 %vm216_vm1, %v385_v10 }
  0x15   : > { %400 = vmatmul.mubr.msk.bf16.vlgmr.msra.gmra.mrb[0].mxu1 %vm216_vm1, %v387_v13 }
  0xe7   : > { %v397_v15 = vpop.f32.mrb[0].mxu0 }
  0xe8   : > { %v276_v16 = vadd.f32 %v397_v15, %v371_v14  ;;  %v401_v17 = vpop.f32.mrb[0].mxu1  ;;  %v267_v18 = vpop.f32.mrb[1].mxu0 }
  0xe9   : > { %v292_v19 = vadd.f32 %v401_v17, %v371_v14  ;;  %v268_v20 = vadd.f32 %v371_v14, %v267_v18  ;;  %v283_v21 = vpop.f32.mrb[1].mxu1  ;;  %v398_v22 = vpop.f32.mrb[2].mxu0 }
  0xea   : > { %301 = vst.msk [vmem:[%s170_s24 + $0x10] sm:$0xff] %vm298_vm2, %v276_v16  ;;  %v284_v23 = vadd.f32 %v371_v14, %v283_v21  ;;  %v279_v24 = vadd.f32 %v398_v22, %v371_v14  ;;  %v402_v25 = vpop.f32.mrb[2].mxu1  ;;  %v270_v26 = vpop.f32.mrb[3].mxu0 }
  0xeb   : > { %305 = vst.msk [vmem:[%s170_s24 + $0x30] sm:$0xff] %vm298_vm2, %v292_v19  ;;  %299 = vst.msk [vmem:[%s170_s24] sm:$0xff] %vm298_vm2, %v268_v20  ;;  %v295_v27 = vadd.f32 %v402_v25, %v371_v14  ;;  %v271_v28 = vadd.f32 %v371_v14, %v270_v26  ;;  %v286_v29 = vpop.f32.mrb[3].mxu1 }
  0xec   : > { %303 = vst.msk [vmem:[%s170_s24 + $0x20] sm:$0xff] %vm298_vm2, %v284_v23  ;;  %302 = vst.msk [vmem:[%s170_s24 + $0x18] sm:$0xff] %vm298_vm2, %v279_v24  ;;  %v287_v30 = vadd.f32 %v371_v14, %v286_v29 }
  0xed   : > { %306 = vst.msk [vmem:[%s170_s24 + $0x38] sm:$0xff] %vm298_vm2, %v295_v27  ;;  %300 = vst.msk [vmem:[%s170_s24 + $0x8] sm:$0xff] %vm298_vm2, %v271_v28 }
  0xee   : > { %304 = vst.msk [vmem:[%s170_s24 + $0x28] sm:$0xff] %vm298_vm2, %v287_v30 }
  0xef PF: > { %s13_s12 = sadd.s32 1, %s421_s12  }
  0xf0   : > { %p10_p4 = scmp.ge.s32.totalorder %s13_s12, 4  }
  0xf2   :  { %12 = sbr.rel (!%p10_p4) target bundleno = 1 (0x1), region = 62 }

// kernel: up_conv_forward.3
= control target key start
LH: loop header
LB: loop body
LE: loop exit
PB: predicated region body
PF: predicated region fallthrough
CT: control target
= control target key end

     0   :  { %s3602_s18 = smov 0   ;;  %s3604_s19 = smov 0   ;;  %s4927_s0 = inlined_call_operand.vmem [shape: f32[2,20,18,8], index: 0, kind: input, shape index: {}]   ;;  %s4928_s1 = inlined_call_operand.vmem [shape: bf16[72,8], index: 1, kind: input, shape index: {}]   ;;  %s4929_s2 = inlined_call_operand.vmem [shape: f32[1,8], index: 2, kind: input, shape index: {}]   ;;  %s4930_s3 = inlined_call_operand.vmem [shape: bf16[72,8], index: 3, kind: input, shape index: {}]   ;;  %s4931_s4 = inlined_call_operand.vmem [shape: f32[1,8], index: 4, kind: input, shape index: {}]   ;;  %s4932_s5 = inlined_call_operand.vmem [shape: f32[2,16,16,8], index: 5, kind: output, shape index: {}]  }
   0x1   :  { %s3606_s20 = smov 0   ;;  %s3608_s21 = smov 0  }
   0x2   :  { %s3610_s22 = smov 0  }
   0x3 LB: > { %s24_s23 = sadd.s32 1, %s3553_s20  ;;  %s27_s24 = sadd.s32 1, %s3557_s21  ;;  %s3561_s22 = sphi %s3610_s22, %s15_s22   ;;  %s3557_s21 = sphi %s3608_s21, %s4992_s21   ;;  %s3553_s20 = sphi %s3606_s20, %s4991_s20   ;;  %s3549_s19 = sphi %s3604_s19, %s4990_s19   ;;  %s3545_s18 = sphi %s3602_s18, %s4989_s18  }
   0x4   : > { %p25_p0 = scmp.ge.s32.totalorder %s24_s23, 2  ;;  %p2610_p1 = scmp.ge.s32.totalorder %s3561_s22, 1 }
   0x5   : > { %p201_p2 = scmp.lt.s32.totalorder %s3561_s22, 5 }
   0x6   : > { %s4994_s23 = smov (%p25_p0, %s24_s23), 0  ;;  %s4996_s24 = smov (!%p25_p0, %s27_s24), %s3557_s21 }
   0x7   : > { %p202_p3 = pnand %p2610_p1, %p201_p2  ;;  %p29_p4 = scmp.ge.s32.totalorder %s4996_s24, 2 }
   0x8   : > { %p234_p5 = scmp.lt.s32.totalorder (!%p202_p3), %s3549_s19, 1  ;;  %s2617_s25 = smul.u32 (!%p202_p3), 192, %s3545_s18  ;;  %vm431_vm0 = vcmask (!%p202_p3), 1045504   ;;  %vm320_vm1 = vcmask (!%p202_p3), 1046528   ;;  %v3507_v45 = vld [vmem:[%s4928_s1] sm:$0xff] (!%p202_p3)   ;;  %v3508_v50 = vld [vmem:[%s4928_s1 + $0x8] sm:$0xff] (!%p202_p3)  }
   0x9   : > { %s4998_s24 = smov (%p29_p4, %s4996_s24), 0  ;;  %205 = sbr.rel (%p202_p3) target bundleno = 897 (0x381), region = 40 }
   0xa   : > { %s3563_s6 = smov (!%p202_p3), 24   ;;  %s3564_s7 = smov (!%p202_p3), 16   ;;  %2679 = vmatprep.subr.bf16.mxu0 (!%p202_p3), %v3507_v45  ;;  %v3509_v55 = vld [vmem:[%s4928_s1 + $0x10] sm:$0xff] (!%p202_p3)   ;;  %vm1180_vm2 = vcmask (!%p202_p3), 1043456   ;;  %vm928_vm3 = vcmask (!%p202_p3), 64512   ;;  %vm949_vm4 = vcmask (!%p202_p3), 130048  }
   0xb   : > { %s3565_s8 = smov (!%p202_p3), 8   ;;  %2680 = vmatpush3.bf16.msra.mxu0 (!%p202_p3), %v3507_v45  ;;  %s3566_s13 = smov (!%p202_p3), 32   ;;  %vm970_vm5 = vcmask (!%p202_p3), 195584   ;;  %vm991_vm6 = vcmask (!%p202_p3), 261120   ;;  %vm1012_vm7 = vcmask (!%p202_p3), 326656   ;;  %vm1033_vm8 = vcmask (!%p202_p3), 392192  }
   0xc   : > { %2681 = vmatprep.subr.bf16.mxu0 (!%p202_p3), %v3508_v50  ;;  %s3567_s16 = smov (!%p202_p3), 40   ;;  %s3569_s27 = smov (!%p202_p3), 56   ;;  %vm4935_vm9 = vcmask (!%p202_p3), 457728   ;;  %vm4934_vm10 = vcmask (!%p202_p3), 523264   ;;  %vm4933_vm11 = vcmask (!%p202_p3), 588800   ;;  %vm1440_vm12 = vcmask (!%p202_p3), 58368  }
   0xd   : > { %s3570_s28 = smov (!%p202_p3), 64  }
   0xf   : > { %2682 = vmatpush3.bf16.msra.mxu0 (!%p202_p3), %v3508_v50 }
  0x10   : > { %s5000_s19 = smov (!%p234_p5, %s3549_s19), 1  ;;  %2683 = vmatprep.subr.bf16.mxu0 %v3509_v55 }
  0x11   : > { %s2737_s26 = smul.u32 480, %s5000_s19 }
  0x13   : > { %s238_s29 = scalar_lea.vmem %s4927_s0, %s2737_s26  ;;  %2684 = vmatpush3.bf16.msra.mxu0 %v3509_v55  ;;  %s3568_s26 = smov 48  }
  0x14   : > { %s3641_s30 = scalar_lea.vmem %s238_s29, %s2617_s25 }
  0x15   : > { %v3644_v0 = vld [vmem:[%s3641_s30 + $0x30] sm:$0xff]  ;;  %v3647_v1 = vld [vmem:[%s3641_s30 + $0x38] sm:$0xff]  ;;  %v3657_v4 = vld [vmem:[%s3641_s30 + $0x20] sm:$0xff] }
  0x16   : > { %v3650_v2 = vld [vmem:[%s3641_s30 + $0x18] sm:$0xff]  ;;  %v3654_v3 = vpack.i.bf16 %v3647_v1, %v3644_v0  ;;  %v3660_v5 = vld [vmem:[%s3641_s30] sm:$0xff]  ;;  %v3663_v6 = vld [vmem:[%s3641_s30 + $0x8] sm:$0xff]  ;;  %v331_v9 = vrot.slane %v3644_v0, 1  ;;  %v438_v19 = vrot.slane %v3657_v4, 2  ;;  %v327_v22 = vrot.slane %v3657_v4, 1 }
  0x17   : > { %v437_v7 = vrot.slane %v3650_v2, 2  ;;  %v326_v8 = vrot.slane %v3650_v2, 1  ;;  %v2787_v10 = vpack.i.bf16 %v3657_v4, %v3650_v2  ;;  %v256_v11 = vld [vmem:[%s3641_s30 + $0x10] sm:$0x3]  ;;  %v432_v12 = vrot.slane %v3660_v5, 2  ;;  %v3702_v44 = vld [vmem:[%s3641_s30 + $0x48] sm:$0xff] }
  0x18   : > { %v433_v13 = vrot.slane %v3663_v6, 2  ;;  %v321_v14 = vrot.slane %v3660_v5, 1  ;;  %2793 = vrot.lane.b32.xlu1 %v3654_v3, %s3563_s6  ;;  %v435_v15 = vrot.slane %v256_v11, 2  ;;  %v322_v16 = vrot.slane %v3663_v6, 1  ;;  %v259_v18 = vld [vmem:[%s3641_s30 + $0x28] sm:$0x3] }
  0x19   : > { %v324_v17 = vrot.slane %v256_v11, 1  ;;  %2788 = vrot.lane.b32.xlu0 %v2787_v10, %s3563_s6  ;;  %v440_v21 = vrot.slane %v259_v18, 2  ;;  %v329_v23 = vrot.slane %v259_v18, 1  ;;  %v262_v24 = vld [vmem:[%s3641_s30 + $0x40] sm:$0x3]  ;;  %v439_v28 = vsel %vm431_vm0, %v437_v7, %v438_v19  ;;  %v3710_v48 = vld [vmem:[%s3641_s30 + $0x50] sm:$0xff] }
  0x1a   : > { %v434_v20 = vsel %vm431_vm0, %v432_v12, %v433_v13  ;;  %v436_v25 = vsel %vm431_vm0, %v433_v13, %v435_v15  ;;  %v323_v26 = vsel %vm320_vm1, %v321_v14, %v322_v16  ;;  %v328_v32 = vsel %vm320_vm1, %v326_v8, %v327_v22  ;;  %v265_v49 = vld [vmem:[%s3641_s30 + $0x58] sm:$0x3]  ;;  %v3738_v62 = vld [vmem:[%s3641_s30 + $0x60] sm:$0xff]  ;;  %v3741_v63 = vld [vmem:[%s3641_s30 + $0x68] sm:$0xff] }
  0x1b   : > { %v325_v27 = vsel %vm320_vm1, %v322_v16, %v324_v17  ;;  %v2807_v29 = vpack.i.bf16 %v436_v25, %v434_v20  ;;  %v441_v31 = vsel %vm431_vm0, %v438_v19, %v440_v21  ;;  %v330_v33 = vsel %vm320_vm1, %v327_v22, %v329_v23  ;;  %v3744_v7 = vld [vmem:[%s3641_s30 + $0x90] sm:$0xff]  ;;  %v3510_v8 = vld [vmem:[%s4928_s1 + $0x18] sm:$0xff]   ;;  %v274_v10 = vld [vmem:[%s3641_s30 + $0xa0] sm:$0x3] }
  0x1c   : > { %v2797_v30 = vpack.i.bf16 %v325_v27, %v323_v26  ;;  %v332_v34 = vrot.slane %v3647_v1, 1  ;;  %v334_v35 = vrot.slane %v262_v24, 1  ;;  %v2812_v36 = vpack.i.bf16 %v441_v31, %v439_v28  ;;  %v3756_v12 = vld [vmem:[%s3641_s30 + $0x70] sm:$0x3]  ;;  %v3772_v20 = vld [vmem:[%s3641_s30 + $0xa8] sm:$0xff]  ;;  %2685 = vmatprep.subr.bf16.mxu0 %v3510_v8 }
  0x1d   : > { %2808 = vrot.lane.b32.xlu1 %v2807_v29, %s3564_s7  ;;  %v2802_v37 = vpack.i.bf16 %v330_v33, %v328_v32  ;;  %v442_v38 = vrot.slane %v3644_v0, 2  ;;  %v443_v41 = vrot.slane %v3647_v1, 2  ;;  %v445_v42 = vrot.slane %v262_v24, 2  ;;  %v3775_v21 = vld [vmem:[%s3641_s30 + $0xb0] sm:$0xff]  ;;  %v277_v25 = vld [vmem:[%s3641_s30 + $0xb8] sm:$0x3]  ;;  %2686 = vmatpush3.bf16.msra.mxu0 %v3510_v8 }
  0x1e   : > { %2798 = vrot.lane.b32.xlu0 %v2797_v30, %s3565_s8  ;;  %v333_v39 = vsel %vm320_vm1, %v331_v9, %v332_v34  ;;  %v335_v40 = vsel %vm320_vm1, %v332_v34, %v334_v35  ;;  %v336_v52 = vrot.slane %v3702_v44, 1  ;;  %v337_v53 = vrot.slane %v3710_v48, 1  ;;  %v3750_v9 = vld [vmem:[%s3641_s30 + $0x98] sm:$0xff]  ;;  %v3807_v45 = vld [vmem:[%s3641_s30 + $0xc8] sm:$0xff]  ;;  %v3830_v8 = vld [vmem:[%s3641_s30 + $0xe0] sm:$0xff] }
  0x1f   : > { %v3699_v43 = vpack.i.bf16 %v335_v40, %v333_v39  ;;  %v444_v46 = vsel %vm431_vm0, %v442_v38, %v443_v41  ;;  %v446_v47 = vsel %vm431_vm0, %v443_v41, %v445_v42  ;;  %v339_v54 = vrot.slane %v265_v49, 1  ;;  %v3800_v38 = vld [vmem:[%s3641_s30 + $0xc0] sm:$0xff] }
  0x20   : > { %v3719_v51 = vpack.i.bf16 %v446_v47, %v444_v46  ;;  %v3728_v56 = vpack.i.bf16 %v3710_v48, %v3702_v44  ;;  %v447_v57 = vrot.slane %v3702_v44, 2  ;;  %v338_v58 = vsel %vm320_vm1, %v336_v52, %v337_v53  ;;  %v280_v46 = vld [vmem:[%s3641_s30 + $0xd0] sm:$0x3] }
  0x21   : > { %2813 = vrot.lane.b32.xlu1 %v2812_v36, %s3564_s7  ;;  %v340_v59 = vsel %vm320_vm1, %v337_v53, %v339_v54  ;;  %v448_v60 = vrot.slane %v3710_v48, 2  ;;  %v450_v61 = vrot.slane %v265_v49, 2  ;;  %v3766_v15 = vpack.i.bf16 %v3741_v63, %v3738_v62 }
  0x22   : > { %2803 = vrot.lane.b32.xlu0 %v2802_v37, %s3565_s8  ;;  %v3753_v11 = vpack.i.bf16 %v340_v59, %v338_v58  ;;  %v351_v16 = vrot.slane %v3744_v7, 1  ;;  %v341_v17 = vrot.slane %v3738_v62, 1  ;;  %v352_v18 = vrot.slane %v3750_v9, 1 }
  0x23   : > { %v449_v13 = vsel %vm431_vm0, %v447_v57, %v448_v60  ;;  %v451_v14 = vsel %vm431_vm0, %v448_v60, %v450_v61  ;;  %v354_v19 = vrot.slane %v274_v10, 1  ;;  %v344_v22 = vrot.slane %v3756_v12, 1  ;;  %v3827_v61 = vld [vmem:[%s3641_s30 + $0xd8] sm:$0xff] }
  0x24   : > { %v462_v23 = vrot.slane %v3744_v7, 2  ;;  %v463_v24 = vrot.slane %v3750_v9, 2  ;;  %v3782_v26 = vpack.i.bf16 %v451_v14, %v449_v13  ;;  %v353_v27 = vsel %vm320_vm1, %v351_v16, %v352_v18 }
  0x25   : > { %2823 = vrot.lane.b32.xlu1 %v3699_v43, %s3566_s13  ;;  %v355_v28 = vsel %vm320_vm1, %v352_v18, %v354_v19  ;;  %v465_v29 = vrot.slane %v274_v10, 2  ;;  %v356_v32 = vrot.slane %v3772_v20, 1  ;;  %v452_v33 = vrot.slane %v3738_v62, 2  ;;  %v283_v10 = vld [vmem:[%s3641_s30 + $0xe8] sm:$0x3] }
  0x26   : > { %2818 = vrot.lane.b32.xlu0 %v2802_v37, %s3566_s13  ;;  %v3790_v30 = vpack.i.bf16 %v355_v28, %v353_v27  ;;  %v464_v31 = vsel %vm431_vm0, %v462_v23, %v463_v24  ;;  %v357_v35 = vrot.slane %v3775_v21, 1  ;;  %v467_v41 = vrot.slane %v3772_v20, 2 }
  0x27   : > { %v466_v34 = vsel %vm431_vm0, %v463_v24, %v465_v29  ;;  %v468_v42 = vrot.slane %v3775_v21, 2  ;;  %v470_v49 = vrot.slane %v277_v25, 2  ;;  %v453_v52 = vrot.slane %v3741_v63, 2 }
  0x28   : > { %v3797_v37 = vpack.i.bf16 %v466_v34, %v464_v31  ;;  %v358_v39 = vsel %vm320_vm1, %v356_v32, %v357_v35  ;;  %v361_v54 = vrot.slane %v3800_v38, 1  ;;  %v364_v57 = vrot.slane %v280_v46, 1 }
  0x29   : > { %2833 = vrot.lane.b32.xlu1 %v3719_v51, %s3567_s16  ;;  %v469_v53 = vsel %vm431_vm0, %v467_v41, %v468_v42  ;;  %v471_v55 = vsel %vm431_vm0, %v468_v42, %v470_v49  ;;  %v472_v59 = vrot.slane %v3800_v38, 2  ;;  %v473_v60 = vrot.slane %v3807_v45, 2  ;;  %v286_v41 = vld [vmem:[%s3641_s30 + $0x100] sm:$0x3] }
  0x2a   : > { %2828 = vrot.lane.b32.xlu0 %v2812_v36, %s3567_s16  ;;  %v359_v36 = vrot.slane %v277_v25, 1  ;;  %v3822_v58 = vpack.i.bf16 %v471_v55, %v469_v53  ;;  %v475_v16 = vrot.slane %v280_v46, 2  ;;  %v455_v18 = vrot.slane %v3756_v12, 2  ;;  %v3854_v12 = vld [vmem:[%s3641_s30 + $0x78] sm:$0xff]  ;;  %v3874_v46 = vld [vmem:[%s3641_s30 + $0x80] sm:$0xff]  ;;  %v3888_v55 = vld [vmem:[%s3641_s30 + $0x110] sm:$0xff] }
  0x2b   : > { %v474_v23 = vsel %vm431_vm0, %v472_v59, %v473_v60  ;;  %v366_v25 = vrot.slane %v3827_v61, 1  ;;  %v367_v27 = vrot.slane %v3830_v8, 1  ;;  %v369_v28 = vrot.slane %v283_v10, 1 }
  0x2c   : > { %v360_v40 = vsel %vm320_vm1, %v357_v35, %v359_v36  ;;  %v476_v24 = vsel %vm431_vm0, %v473_v60, %v475_v16  ;;  %v477_v31 = vrot.slane %v3827_v61, 2  ;;  %v478_v34 = vrot.slane %v3830_v8, 2  ;;  %v3863_v36 = vld [vmem:[%s3641_s30 + $0xf0] sm:$0xff]  ;;  %v3511_v60 = vld [vmem:[%s4928_s1 + $0x20] ss:$0 sps:$4 sm:$0xff]   ;;  %v3899_v16 = vld [vmem:[%s3641_s30 + $0x108] sm:$0xff] }
  0x2d   : > { %2843 = vrot.lane.b32.xlu1 %v3728_v56, %s3568_s26  ;;  %v3814_v47 = vpack.i.bf16 %v360_v40, %v358_v39  ;;  %v3847_v29 = vpack.i.bf16 %v476_v24, %v474_v23  ;;  %v480_v35 = vrot.slane %v283_v10, 2  ;;  %v3866_v39 = vld [vmem:[%s3641_s30 + $0xf8] sm:$0xff]  ;;  %v456_v42 = vsel %vm431_vm0, %v453_v52, %v455_v18  ;;  %v271_v10 = vld [vmem:[%s3641_s30 + $0x88] sm:$0x3]  ;;  %2735 = vmatprep.subr.msk.bf16.mxu0 %vm1180_vm2, %v3511_v60 }
  0x2e   : > { %2838 = vrot.lane.b32.xlu0 %v3654_v3, %s3568_s26  ;;  %v342_v3 = vrot.slane %v3741_v63, 1  ;;  %v346_v49 = vrot.slane %v3854_v12, 1  ;;  %v479_v53 = vsel %vm431_vm0, %v477_v31, %v478_v34  ;;  %v671_v59 = vrot.slane %v3866_v39, 2  ;;  %v289_v24 = vld [vmem:[%s3641_s30 + $0x118] sm:$0x3] }
  0x2f   : > { %v799_v23 = vrot.slane %v3888_v55, 1 }
  0x30   : > { %v343_v50 = vsel %vm320_vm1, %v341_v17, %v342_v3  ;;  %v345_v17 = vsel %vm320_vm1, %v342_v3, %v344_v22  ;;  %v368_v3 = vsel %vm320_vm1, %v366_v25, %v367_v27  ;;  %v370_v22 = vsel %vm320_vm1, %v367_v27, %v369_v28 }
  0x31   : > { %2853 = vrot.lane.b32.xlu1 %v3753_v11, %s3569_s27  ;;  %v3859_v32 = vpack.i.bf16 %v370_v22, %v368_v3  ;;  %v3868_v40 = vpack.i.bf16 %v345_v17, %v343_v50  ;;  %v605_v50 = vrot.slane %v3863_v36, 1  ;;  %v864_v3 = vrot.slane %v3888_v55, 2 }
  0x32   : > { %2848 = vrot.lane.b32.xlu0 %v3699_v43, %s3569_s27  ;;  %v349_v22 = vrot.slane %v271_v10, 1 }
  0x35   : > { %2863 = vrot.lane.b32.xlu1 %v3699_v43, %s3565_s8  ;;  %v362_v43 = vrot.slane %v3807_v45, 1 }
  0x36   : > { %2858 = vrot.lane.b32.xlu0 %v3719_v51, %s3570_s28 }
  0x37   : > { %v363_v13 = vsel %vm320_vm1, %v361_v54, %v362_v43  ;;  %v365_v14 = vsel %vm320_vm1, %v362_v43, %v364_v57  ;;  %v481_v54 = vsel %vm431_vm0, %v478_v34, %v480_v35  ;;  %v608_v43 = vrot.slane %v286_v41, 1 }
  0x38   : > { %v3841_v19 = vpack.i.bf16 %v365_v14, %v363_v13  ;;  %v670_v57 = vrot.slane %v3863_v36, 2  ;;  %v673_v14 = vrot.slane %v286_v41, 2  ;;  %v798_v34 = vrot.slane %v3899_v16, 1 }
  0x39   : > { %2873 = vrot.lane.b32.xlu1 %v3753_v11, %s3565_s8  ;;  %v863_v35 = vrot.slane %v3899_v16, 2  ;;  %v1182_v41 = vsel %vm1180_vm2, %v3511_v60, 0 }
  0x3a   : > { %2868 = vrot.lane.b32.xlu0 %v3782_v26, %s3570_s28  ;;  %v672_v18 = vsel %vm431_vm0, %v670_v57, %v671_v59  ;;  %v674_v28 = vsel %vm431_vm0, %v671_v59, %v673_v14  ;;  %2688 = vmatpush3.bf16.msra.mxu0 %v1182_v41 }
  0x3b   : > { %v3913_v31 = vpack.i.bf16 %v674_v28, %v672_v18 }
  0x3d   : > { %2883 = vrot.lane.b32.xlu1 %v3782_v26, %s3564_s7 }
  0x3e   : > { %2878 = vrot.lane.b32.xlu0 %v3719_v51, %s3564_s7  ;;  %v454_v51 = vsel %vm431_vm0, %v452_v33, %v453_v52  ;;  %v3883_v33 = vpack.i.bf16 %v481_v54, %v479_v53  ;;  %v606_v52 = vrot.slane %v3866_v39, 1  ;;  %v801_v53 = vrot.slane %v289_v24, 1 }
  0x3f   : > { %v2912_v25 = vpack.i.bf16 %v456_v42, %v454_v51  ;;  %v3923_v51 = vsel %vm431_vm0, %v863_v35, %v864_v3  ;;  %v866_v42 = vrot.slane %v289_v24, 2  ;;  %v2922_v54 = vpack.i.bf16 %v3874_v46, %v3854_v12 }
  0x40   : > { %v607_v13 = vsel %vm320_vm1, %v605_v50, %v606_v52  ;;  %v609_v17 = vsel %vm320_vm1, %v606_v52, %v608_v43  ;;  %v3931_v50 = vsel %vm320_vm1, %v799_v23, %v801_v53 }
  0x41   : > { %2893 = vrot.lane.b32.xlu1 %v3766_v15, %s3563_s6  ;;  %v3909_v27 = vpack.i.bf16 %v609_v17, %v607_v13  ;;  %v3938_v59 = vsel %vm431_vm0, %v864_v3, %v866_v42  ;;  %v457_v13 = vrot.slane %v3854_v12, 2 }
  0x42   : > { %2888 = vrot.lane.b32.xlu0 %v3728_v56, %s3563_s6  ;;  %v347_v56 = vrot.slane %v3874_v46, 1  ;;  %v3182_v60 = vpack.i.bf16 %v3938_v59, %v3923_v51 }
  0x44   : > { %v348_v52 = vsel %vm320_vm1, %v346_v49, %v347_v56  ;;  %v350_v43 = vsel %vm320_vm1, %v347_v56, %v349_v22  ;;  %v458_v49 = vrot.slane %v3874_v46, 2  ;;  %v460_v56 = vrot.slane %v271_v10, 2 }
  0x45   : > { %2903 = vrot.lane.b32.xlu1 %v3868_v40, %s3566_s13  ;;  %v2972_v10 = vpack.i.bf16 %v3750_v9, %v3744_v7  ;;  %v3052_v7 = vpack.i.bf16 %v3807_v45, %v3800_v38  ;;  %v3082_v9 = vpack.i.bf16 %v3830_v8, %v3827_v61 }
  0x46   : > { %2898 = vrot.lane.b32.xlu0 %v3753_v11, %s3566_s13  ;;  %v3920_v11 = vsel %vm320_vm1, %v798_v34, %v799_v23  ;;  %v459_v14 = vsel %vm431_vm0, %v457_v13, %v458_v49  ;;  %v461_v17 = vsel %vm431_vm0, %v458_v49, %v460_v56  ;;  %v4025_v34 = vpack.i.bf16 %v3866_v39, %v3863_v36 }
  0x47   : > { %v3172_v57 = vpack.i.bf16 %v3931_v50, %v3920_v11 }
  0x49   : > { %2913 = vrot.lane.b32.xlu1 %v2912_v25, %s3567_s16 }
  0x4a   : > { %2908 = vrot.lane.b32.xlu0 %v3782_v26, %s3567_s16  ;;  %v2932_v26 = vpack.i.bf16 %v350_v43, %v348_v52 }
  0x4d   : > { %2923 = vrot.lane.b32.xlu1 %v2922_v54, %s3568_s26 }
  0x4e   : > { %2918 = vrot.lane.b32.xlu0 %v3766_v15, %s3568_s26  ;;  %v2947_v15 = vpack.i.bf16 %v461_v17, %v459_v14 }
  0x51   : > { %2933 = vrot.lane.b32.xlu1 %v2932_v26, %s3569_s27 }
  0x52   : > { %2928 = vrot.lane.b32.xlu0 %v3868_v40, %s3569_s27 }
  0x55   : > { %2943 = vrot.lane.b32.xlu1 %v3868_v40, %s3565_s8  ;;  %v3002_v40 = vpack.i.bf16 %v3775_v21, %v3772_v20 }
  0x56   : > { %2938 = vrot.lane.b32.xlu0 %v2912_v25, %s3570_s28 }
  0x59   : > { %2953 = vrot.lane.b32.xlu1 %v2932_v26, %s3565_s8 }
  0x5a   : > { %2948 = vrot.lane.b32.xlu0 %v2947_v15, %s3570_s28 }
  0x5d   : > { %2963 = vrot.lane.b32.xlu1 %v2947_v15, %s3564_s7 }
  0x5e   : > { %2958 = vrot.lane.b32.xlu0 %v2912_v25, %s3564_s7 }
  0x61   : > { %2973 = vrot.lane.b32.xlu1 %v2972_v10, %s3563_s6 }
  0x62   : > { %2968 = vrot.lane.b32.xlu0 %v2922_v54, %s3563_s6 }
  0x65   : > { %2983 = vrot.lane.b32.xlu1 %v3790_v30, %s3566_s13 }
  0x66   : > { %2978 = vrot.lane.b32.xlu0 %v2932_v26, %s3566_s13 }
  0x69   : > { %2993 = vrot.lane.b32.xlu1 %v3797_v37, %s3567_s16 }
  0x6a   : > { %2988 = vrot.lane.b32.xlu0 %v2947_v15, %s3567_s16 }
  0x6d   : > { %3003 = vrot.lane.b32.xlu1 %v3002_v40, %s3568_s26 }
  0x6e   : > { %2998 = vrot.lane.b32.xlu0 %v2972_v10, %s3568_s26 }
  0x71   : > { %3013 = vrot.lane.b32.xlu1 %v3814_v47, %s3569_s27 }
  0x72   : > { %3008 = vrot.lane.b32.xlu0 %v3790_v30, %s3569_s27 }
  0x75   : > { %3023 = vrot.lane.b32.xlu1 %v3790_v30, %s3565_s8 }
  0x76   : > { %3018 = vrot.lane.b32.xlu0 %v3797_v37, %s3570_s28 }
  0x79   : > { %3033 = vrot.lane.b32.xlu1 %v3814_v47, %s3565_s8 }
  0x7a   : > { %3028 = vrot.lane.b32.xlu0 %v3822_v58, %s3570_s28 }
  0x7d   : > { %3043 = vrot.lane.b32.xlu1 %v3822_v58, %s3564_s7 }
  0x7e   : > { %3038 = vrot.lane.b32.xlu0 %v3797_v37, %s3564_s7 }
  0x81   : > { %3053 = vrot.lane.b32.xlu1 %v3052_v7, %s3563_s6 }
  0x82   : > { %3048 = vrot.lane.b32.xlu0 %v3002_v40, %s3563_s6 }
  0x85   : > { %3063 = vrot.lane.b32.xlu1 %v3841_v19, %s3566_s13 }
  0x86   : > { %3058 = vrot.lane.b32.xlu0 %v3814_v47, %s3566_s13 }
  0x89   : > { %3073 = vrot.lane.b32.xlu1 %v3847_v29, %s3567_s16 }
  0x8a   : > { %3068 = vrot.lane.b32.xlu0 %v3822_v58, %s3567_s16  ;;  %v4003_v30 = vpop.permute.xlu1 %2793 }
  0x8b   : > { %v2789_v37 = vpop.permute.xlu0 %2788  ;;  %v2796_v43 = vunpack.i.h.bf16 %v4003_v30  ;;  %v2795_v26 = vunpack.i.l.bf16 %v4003_v30 }
  0x8c   : > { %v2790_v13 = vunpack.i.l.bf16 %v2789_v37 }
  0x8d   : > { %3083 = vrot.lane.b32.xlu1 %v3082_v9, %s3568_s26 }
  0x8e   : > { %3078 = vrot.lane.b32.xlu0 %v3052_v7, %s3568_s26 }
  0x8f   : > { %v2809_v38 = vpop.permute.xlu1 %2808 }
  0x90   : > { %v2799_v45 = vpop.permute.xlu0 %2798  ;;  %v2811_v3 = vunpack.i.h.bf16 %v2809_v38  ;;  %v2810_v22 = vunpack.i.l.bf16 %v2809_v38 }
  0x91   : > { %3093 = vrot.lane.b32.xlu1 %v3859_v32, %s3569_s27  ;;  %v2801_v18 = vunpack.i.h.bf16 %v2799_v45  ;;  %v2800_v23 = vunpack.i.l.bf16 %v2799_v45 }
  0x92   : > { %3088 = vrot.lane.b32.xlu0 %v3841_v19, %s3569_s27 }
  0x93   : > { %v2814_v47 = vpop.permute.xlu1 %2813  ;;  %v930_v35 = vsel %vm928_vm3, %v3663_v6, %v2801_v18  ;;  %v929_v41 = vsel %vm928_vm3, %v3660_v5, %v2800_v23 }
  0x94   : > { %v2804_v58 = vpop.permute.xlu0 %2803  ;;  %v2816_v53 = vunpack.i.h.bf16 %v2814_v47  ;;  %v2815_v42 = vunpack.i.l.bf16 %v2814_v47  ;;  %v951_v54 = vsel %vm949_vm4, %v930_v35, %v2811_v3  ;;  %v950_v52 = vsel %vm949_vm4, %v929_v41, %v2810_v22 }
  0x95   : > { %3103 = vrot.lane.b32.xlu1 %v3841_v19, %s3565_s8  ;;  %v2806_v24 = vunpack.i.h.bf16 %v2804_v58  ;;  %v2805_v25 = vunpack.i.l.bf16 %v2804_v58  ;;  %v971_v17 = vsel %vm970_vm5, %v950_v52, %v2790_v13 }
  0x96   : > { %3098 = vrot.lane.b32.xlu0 %v3847_v29, %s3570_s28 }
  0x97   : > { %v4015_v61 = vpop.permute.xlu1 %2823  ;;  %v932_v36 = vsel %vm928_vm3, %v3657_v4, %v2806_v24  ;;  %v931_v6 = vsel %vm928_vm3, %v3650_v2, %v2805_v25  ;;  %v2791_v4 = vunpack.i.h.bf16 %v2789_v37 }
  0x98   : > { %v2819_v8 = vpop.permute.xlu0 %2818  ;;  %v953_v2 = vsel %vm949_vm4, %v932_v36, %v2816_v53  ;;  %v952_v49 = vsel %vm949_vm4, %v931_v6, %v2815_v42  ;;  %v2826_v37 = vunpack.i.h.bf16 %v4015_v61  ;;  %v2825_v38 = vunpack.i.l.bf16 %v4015_v61 }
  0x99   : > { %3113 = vrot.lane.b32.xlu1 %v3859_v32, %s3565_s8  ;;  %v2821_v56 = vunpack.i.h.bf16 %v2819_v8  ;;  %v2820_v14 = vunpack.i.l.bf16 %v2819_v8  ;;  %v972_v15 = vsel %vm970_vm5, %v951_v54, %v2791_v4  ;;  %v973_v47 = vsel %vm970_vm5, %v952_v49, %v2795_v26 }
  0x9a   : > { %3108 = vrot.lane.b32.xlu0 %v3883_v33, %s3570_s28  ;;  %v974_v58 = vsel %vm970_vm5, %v953_v2, %v2796_v43  ;;  %v994_v52 = vsel %vm991_vm6, %v973_v47, %v2825_v38 }
  0x9b   : > { %v4021_v28 = vpop.permute.xlu1 %2833  ;;  %v992_v23 = vsel %vm991_vm6, %v971_v17, %v2820_v14  ;;  %v993_v24 = vsel %vm991_vm6, %v972_v15, %v2821_v56  ;;  %v995_v43 = vsel %vm991_vm6, %v974_v58, %v2826_v37 }
  0x9c   : > { %v2829_v19 = vpop.permute.xlu0 %2828  ;;  %v2836_v61 = vunpack.i.h.bf16 %v4021_v28  ;;  %v2835_v25 = vunpack.i.l.bf16 %v4021_v28 }
  0x9d   : > { %3123 = vrot.lane.b32.xlu1 %v3883_v33, %s3564_s7  ;;  %v2831_v10 = vunpack.i.h.bf16 %v2829_v19  ;;  %v2830_v40 = vunpack.i.l.bf16 %v2829_v19 }
  0x9e   : > { %3118 = vrot.lane.b32.xlu0 %v3847_v29, %s3564_s7  ;;  %v3162_v29 = vpack.i.bf16 %v3888_v55, %v3899_v16  ;;  %v1015_v13 = vsel %vm1012_vm7, %v994_v52, %v2835_v25  ;;  %v1016_v2 = vsel %vm1012_vm7, %v995_v43, %v2836_v61 }
  0x9f   : > { %v4039_v39 = vpop.permute.xlu1 %2843  ;;  %v1013_v19 = vsel %vm1012_vm7, %v992_v23, %v2830_v40  ;;  %v1014_v3 = vsel %vm1012_vm7, %v993_v24, %v2831_v10 }
  0xa0   : > { %v2839_v5 = vpop.permute.xlu0 %2838  ;;  %v2846_v22 = vunpack.i.h.bf16 %v4039_v39  ;;  %v2845_v35 = vunpack.i.l.bf16 %v4039_v39 }
  0xa1   : > { %3133 = vrot.lane.b32.xlu1 %v4025_v34, %s3563_s6  ;;  %v2841_v45 = vunpack.i.h.bf16 %v2839_v5 }
  0xa2   : > { %3128 = vrot.lane.b32.xlu0 %v3082_v9, %s3563_s6  ;;  %v2840_v9 = vunpack.i.l.bf16 %v2839_v5  ;;  %v1037_v17 = vsel %vm1033_vm8, %v1016_v2, %v2846_v22 }
  0xa3   : > { %v2854_v7 = vpop.permute.xlu1 %2853  ;;  %v1035_v6 = vsel %vm1033_vm8, %v1014_v3, %v2841_v45 }
  0xa4   : > { %v2849_v30 = vpop.permute.xlu0 %2848  ;;  %v1034_v36 = vsel %vm1033_vm8, %v1013_v19, %v2840_v9  ;;  %v2856_v5 = vunpack.i.h.bf16 %v2854_v7  ;;  %v2855_v54 = vunpack.i.l.bf16 %v2854_v7 }
  0xa5   : > { %v2851_v18 = vunpack.i.h.bf16 %v2849_v30  ;;  %v2850_v8 = vunpack.i.l.bf16 %v2849_v30  ;;  %3143 = vrot.lane.b32.xlu1 %v3909_v27, %s3566_s13 }
  0xa6   : > { %3138 = vrot.lane.b32.xlu0 %v3859_v32, %s3566_s13  ;;  %v1058_v7 = vsel %vm4935_vm9, %v1037_v17, %v2856_v5 }
  0xa7   : > { %v4070_v41 = vpop.permute.xlu1 %2863  ;;  %v1055_v28 = vsel %vm4935_vm9, %v1034_v36, %v2850_v8  ;;  %v1056_v39 = vsel %vm4935_vm9, %v1035_v6, %v2851_v18 }
  0xa8   : > { %v2859_v53 = vpop.permute.xlu0 %2858  ;;  %v2866_v47 = vunpack.i.h.bf16 %v4070_v41  ;;  %v2865_v58 = vunpack.i.l.bf16 %v4070_v41 }
  0xa9   : > { %v2861_v32 = vunpack.i.h.bf16 %v2859_v53  ;;  %v2860_v42 = vunpack.i.l.bf16 %v2859_v53  ;;  %3153 = vrot.lane.b32.xlu1 %v3913_v31, %s3567_s16 }
  0xaa   : > { %3148 = vrot.lane.b32.xlu0 %v3883_v33, %s3567_s16  ;;  %v1036_v33 = vsel %vm1033_vm8, %v1015_v13, %v2845_v35  ;;  %v934_v22 = vsel %vm928_vm3, %v3647_v1, %v2866_v47  ;;  %v933_v35 = vsel %vm928_vm3, %v3644_v0, %v2865_v58 }
  0xab   : > { %v1076_v26 = vsel %vm4934_vm10, %v1055_v28, %v2860_v42  ;;  %v1077_v4 = vsel %vm4934_vm10, %v1056_v39, %v2861_v32  ;;  %v2874_v49 = vpop.permute.xlu1 %2873  ;;  %v1057_v40 = vsel %vm4935_vm9, %v1036_v33, %v2855_v54 }
  0xac   : > { %v2869_v56 = vpop.permute.xlu0 %2868  ;;  %v1096_v14 = vpack.c.bf16 %v1077_v4, %v1076_v26  ;;  %v2876_v11 = vunpack.i.h.bf16 %v2874_v49  ;;  %v2875_v50 = vunpack.i.l.bf16 %v2874_v49 }
  0xad   : > { %v2871_v15 = vunpack.i.h.bf16 %v2869_v56  ;;  %v2870_v10 = vunpack.i.l.bf16 %v2869_v56  ;;  %3163 = vrot.lane.b32.xlu1 %v3162_v29, %s3568_s26 }
  0xae   : > { %3158 = vrot.lane.b32.xlu0 %v4025_v34, %s3568_s26  ;;  %2689 = vmatprep.mubr.msk.bf16.mxu0 %vm4933_vm11, %v1096_v14  ;;  %v936_v51 = vsel %vm928_vm3, %v3710_v48, %v2876_v11 }
  0xaf   : > { %v1078_v30 = vsel %vm4934_vm10, %v1057_v40, %v2870_v10  ;;  %v1079_v37 = vsel %vm4934_vm10, %v1058_v7, %v2871_v15  ;;  %v2884_v38 = vpop.permute.xlu1 %2883 }
  0xb0   : > { %v2879_v45 = vpop.permute.xlu0 %2878  ;;  %v1097_v9 = vpack.c.bf16 %v1079_v37, %v1078_v30  ;;  %v2886_v18 = vunpack.i.h.bf16 %v2884_v38  ;;  %v2885_v8 = vunpack.i.l.bf16 %v2884_v38 }
  0xb1   : > { %3173 = vrot.lane.b32.xlu1 %v3172_v57, %s3569_s27  ;;  %v2881_v59 = vunpack.i.h.bf16 %v2879_v45 }
  0xb2   : > { %3168 = vrot.lane.b32.xlu0 %v3909_v27, %s3569_s27  ;;  %2690 = vmatmul.mubr.msk.bf16.vlgmr.msra.gmra.mrb[0].mxu0 %vm4933_vm11, %v1097_v9  ;;  %v957_v48 = vsel %vm949_vm4, %v936_v51, %v2886_v18 }
  0xb3   : > { %v2894_v55 = vpop.permute.xlu1 %2893 }
  0xb4   : > { %v2889_v16 = vpop.permute.xlu0 %2888  ;;  %v2896_v23 = vunpack.i.h.bf16 %v2894_v55  ;;  %v2895_v24 = vunpack.i.l.bf16 %v2894_v55 }
  0xb5   : > { %3183 = vrot.lane.b32.xlu1 %v3182_v60, %s3570_s28  ;;  %v2880_v60 = vunpack.i.l.bf16 %v2879_v45  ;;  %v2891_v19 = vunpack.i.h.bf16 %v2889_v16  ;;  %v2890_v3 = vunpack.i.l.bf16 %v2889_v16 }
  0xb6   : > { %3178 = vrot.lane.b32.xlu0 %v3913_v31, %s3570_s28  ;;  %v935_v31 = vsel %vm928_vm3, %v3702_v44, %v2875_v50  ;;  %v955_v44 = vsel %vm949_vm4, %v934_v22, %v2881_v59  ;;  %v978_v6 = vsel %vm970_vm5, %v957_v48, %v2896_v23 }
  0xb7   : > { %v4112_v34 = vpop.permute.xlu1 %2903  ;;  %v956_v41 = vsel %vm949_vm4, %v935_v31, %v2885_v8  ;;  %v954_v53 = vsel %vm949_vm4, %v933_v35, %v2880_v60  ;;  %v976_v39 = vsel %vm970_vm5, %v955_v44, %v2891_v19 }
  0xb8   : > { %v2899_v29 = vpop.permute.xlu0 %2898  ;;  %v977_v36 = vsel %vm970_vm5, %v956_v41, %v2895_v24  ;;  %v975_v0 = vsel %vm970_vm5, %v954_v53, %v2890_v3  ;;  %v2906_v26 = vunpack.i.h.bf16 %v4112_v34  ;;  %v2905_v4 = vunpack.i.l.bf16 %v4112_v34 }
  0xb9   : > { %v2901_v32 = vunpack.i.h.bf16 %v2899_v29  ;;  %v2900_v42 = vunpack.i.l.bf16 %v2899_v29 }
  0xba   : > { %v998_v11 = vsel %vm991_vm6, %v977_v36, %v2905_v4  ;;  %v999_v50 = vsel %vm991_vm6, %v978_v6, %v2906_v26 }
  0xbb   : > { %v4114_v57 = vpop.permute.xlu1 %2913  ;;  %v996_v49 = vsel %vm991_vm6, %v975_v0, %v2900_v42  ;;  %v997_v56 = vsel %vm991_vm6, %v976_v39, %v2901_v32 }
  0xbc   : > { %v2909_v27 = vpop.permute.xlu0 %2908  ;;  %v2916_v14 = vunpack.i.h.bf16 %v4114_v57  ;;  %v2915_v33 = vunpack.i.l.bf16 %v4114_v57 }
  0xbd   : > { %v2911_v5 = vunpack.i.h.bf16 %v2909_v27  ;;  %v2910_v54 = vunpack.i.l.bf16 %v2909_v27 }
  0xbe   : > { %v1019_v47 = vsel %vm1012_vm7, %v998_v11, %v2915_v33  ;;  %v1020_v58 = vsel %vm1012_vm7, %v999_v50, %v2916_v14 }
  0xbf   : > { %v2924_v61 = vpop.permute.xlu1 %2923  ;;  %v1017_v17 = vsel %vm1012_vm7, %v996_v49, %v2910_v54  ;;  %v1018_v15 = vsel %vm1012_vm7, %v997_v56, %v2911_v5 }
  0xc0   : > { %v2919_v25 = vpop.permute.xlu0 %2918  ;;  %v2926_v10 = vunpack.i.h.bf16 %v2924_v61  ;;  %v2925_v40 = vunpack.i.l.bf16 %v2924_v61 }
  0xc1   : > { %v2921_v52 = vunpack.i.h.bf16 %v2919_v25  ;;  %v2920_v43 = vunpack.i.l.bf16 %v2919_v25 }
  0xc2   : > { %v1040_v31 = vsel %vm1033_vm8, %v1019_v47, %v2925_v40  ;;  %v1041_v59 = vsel %vm1033_vm8, %v1020_v58, %v2926_v10 }
  0xc3   : > { %v2934_v1 = vpop.permute.xlu1 %2933  ;;  %v1038_v37 = vsel %vm1033_vm8, %v1017_v17, %v2920_v43  ;;  %v1039_v38 = vsel %vm1033_vm8, %v1018_v15, %v2921_v52 }
  0xc4   : > { %v2929_v28 = vpop.permute.xlu0 %2928  ;;  %v2936_v55 = vunpack.i.h.bf16 %v2934_v1  ;;  %v2935_v16 = vunpack.i.l.bf16 %v2934_v1 }
  0xc5   : > { %v2931_v13 = vunpack.i.h.bf16 %v2929_v28  ;;  %v2930_v2 = vunpack.i.l.bf16 %v2929_v28 }
  0xc6   : > { %v1061_v24 = vsel %vm4935_vm9, %v1040_v31, %v2935_v16  ;;  %v1062_v61 = vsel %vm4935_vm9, %v1041_v59, %v2936_v55 }
  0xc7   : > { %v2944_v7 = vpop.permute.xlu1 %2943  ;;  %v1059_v34 = vsel %vm4935_vm9, %v1038_v37, %v2930_v2  ;;  %v1060_v29 = vsel %vm4935_vm9, %v1039_v38, %v2931_v13 }
  0xc8   : > { %v2939_v30 = vpop.permute.xlu0 %2938  ;;  %v2946_v5 = vunpack.i.h.bf16 %v2944_v7  ;;  %v2945_v54 = vunpack.i.l.bf16 %v2944_v7 }
  0xc9   : > { %v2941_v45 = vunpack.i.h.bf16 %v2939_v30  ;;  %v2940_v9 = vunpack.i.l.bf16 %v2939_v30 }
  0xca   : > { %v938_v14 = vsel %vm928_vm3, %v3741_v63, %v2946_v5  ;;  %v937_v33 = vsel %vm928_vm3, %v3738_v62, %v2945_v54 }
  0xcb   : > { %v1080_v57 = vsel %vm4934_vm10, %v1059_v34, %v2940_v9  ;;  %v1081_v27 = vsel %vm4934_vm10, %v1060_v29, %v2941_v45  ;;  %v2954_v18 = vpop.permute.xlu1 %2953 }
  0xcc   : > { %v2949_v8 = vpop.permute.xlu0 %2948  ;;  %v1098_v51 = vpack.c.bf16 %v1081_v27, %v1080_v57  ;;  %v2956_v32 = vunpack.i.h.bf16 %v2954_v18  ;;  %v2955_v42 = vunpack.i.l.bf16 %v2954_v18 }
  0xcd   : > { %v2951_v60 = vunpack.i.h.bf16 %v2949_v8  ;;  %v2950_v23 = vunpack.i.l.bf16 %v2949_v8 }
  0xce   : > { %2693 = vmatprep.mubr.msk.bf16.mxu0 %vm4933_vm11, %v1098_v51  ;;  %v940_v0 = vsel %vm928_vm3, %v3874_v46, %v2956_v32  ;;  %v939_v39 = vsel %vm928_vm3, %v3854_v12, %v2955_v42 }
  0xcf   : > { %v1083_v25 = vsel %vm4934_vm10, %v1062_v61, %v2951_v60  ;;  %v1082_v19 = vsel %vm4934_vm10, %v1061_v24, %v2950_v23  ;;  %v2964_v3 = vpop.permute.xlu1 %2963 }
  0xd0   : > { %v2959_v22 = vpop.permute.xlu0 %2958  ;;  %v1099_v35 = vpack.c.bf16 %v1083_v25, %v1082_v19  ;;  %v2966_v1 = vunpack.i.h.bf16 %v2964_v3  ;;  %v2965_v28 = vunpack.i.l.bf16 %v2964_v3 }
  0xd1   : > { %v2961_v52 = vunpack.i.h.bf16 %v2959_v22  ;;  %v2960_v43 = vunpack.i.l.bf16 %v2959_v22 }
  0xd2   : > { %2694 = vmatmul.mubr.msk.bf16.gmra.mrb[4].mxu0 %vm4933_vm11, %v1099_v35  ;;  %v960_v17 = vsel %vm949_vm4, %v939_v39, %v2965_v28  ;;  %v961_v46 = vsel %vm949_vm4, %v940_v0, %v2966_v1 }
  0xd3   : > { %v2974_v41 = vpop.permute.xlu1 %2973  ;;  %v959_v12 = vsel %vm949_vm4, %v938_v14, %v2961_v52  ;;  %v958_v15 = vsel %vm949_vm4, %v937_v33, %v2960_v43 }
  0xd4   : > { %v2969_v48 = vpop.permute.xlu0 %2968  ;;  %v2976_v26 = vunpack.i.h.bf16 %v2974_v41  ;;  %v2975_v4 = vunpack.i.l.bf16 %v2974_v41 }
  0xd5   : > { %v2971_v49 = vunpack.i.h.bf16 %v2969_v48  ;;  %v2970_v56 = vunpack.i.l.bf16 %v2969_v48 }
  0xd6   : > { %v981_v7 = vsel %vm970_vm5, %v960_v17, %v2975_v4  ;;  %v982_v30 = vsel %vm970_vm5, %v961_v46, %v2976_v26 }
  0xd7   : > { %v4160_v44 = vpop.permute.xlu1 %2983  ;;  %v979_v62 = vsel %vm970_vm5, %v958_v15, %v2970_v56  ;;  %v980_v9 = vsel %vm970_vm5, %v959_v12, %v2971_v49 }
  0xd8   : > { %v2979_v53 = vpop.permute.xlu0 %2978  ;;  %v2986_v34 = vunpack.i.h.bf16 %v4160_v44  ;;  %v2985_v29 = vunpack.i.l.bf16 %v4160_v44 }
  0xd9   : > { %v2981_v10 = vunpack.i.h.bf16 %v2979_v53  ;;  %v2980_v40 = vunpack.i.l.bf16 %v2979_v53 }
  0xda   : > { %v1002_v41 = vsel %vm991_vm6, %v981_v7, %v2985_v29  ;;  %v1003_v48 = vsel %vm991_vm6, %v982_v30, %v2986_v34 }
  0xdb   : > { %v4162_v36 = vpop.permute.xlu1 %2993  ;;  %v1000_v57 = vsel %vm991_vm6, %v979_v62, %v2980_v40  ;;  %v1001_v27 = vsel %vm991_vm6, %v980_v9, %v2981_v10 }
  0xdc   : > { %v2989_v6 = vpop.permute.xlu0 %2988  ;;  %v2996_v47 = vunpack.i.h.bf16 %v4162_v36  ;;  %v2995_v58 = vunpack.i.l.bf16 %v4162_v36 }
  0xdd   : > { %v2991_v37 = vunpack.i.h.bf16 %v2989_v6  ;;  %v2990_v38 = vunpack.i.l.bf16 %v2989_v6 }
  0xde   : > { %v1023_v32 = vsel %vm1012_vm7, %v1002_v41, %v2995_v58  ;;  %v1024_v42 = vsel %vm1012_vm7, %v1003_v48, %v2996_v47 }
  0xdf   : > { %v3004_v13 = vpop.permute.xlu1 %3003  ;;  %v1021_v18 = vsel %vm1012_vm7, %v1000_v57, %v2990_v38  ;;  %v1022_v8 = vsel %vm1012_vm7, %v1001_v27, %v2991_v37  ;;  %v3518_v57 = vld [vmem:[%s3641_s30 + $0x90] sm:$0xff] }
  0xe0   : > { %v2999_v2 = vpop.permute.xlu0 %2998  ;;  %v3006_v51 = vunpack.i.h.bf16 %v3004_v13  ;;  %v3005_v31 = vunpack.i.l.bf16 %v3004_v13 }
  0xe1   : > { %v3001_v55 = vunpack.i.h.bf16 %v2999_v2  ;;  %v3000_v16 = vunpack.i.l.bf16 %v2999_v2 }
  0xe2   : > { %v1044_v54 = vsel %vm1033_vm8, %v1023_v32, %v3005_v31  ;;  %v1045_v1 = vsel %vm1033_vm8, %v1024_v42, %v3006_v51 }
  0xe3   : > { %v3014_v63 = vpop.permute.xlu1 %3013  ;;  %v1042_v23 = vsel %vm1033_vm8, %v1021_v18, %v3000_v16  ;;  %v1043_v24 = vsel %vm1033_vm8, %v1022_v8, %v3001_v55 }
  0xe4   : > { %v3009_v45 = vpop.permute.xlu0 %3008  ;;  %v3016_v19 = vunpack.i.h.bf16 %v3014_v63  ;;  %v3015_v3 = vunpack.i.l.bf16 %v3014_v63 }
  0xe5   : > { %v3011_v11 = vunpack.i.h.bf16 %v3009_v45  ;;  %v3010_v50 = vunpack.i.l.bf16 %v3009_v45 }
  0xe6   : > { %v1065_v39 = vsel %vm4935_vm9, %v1044_v54, %v3015_v3  ;;  %v1066_v52 = vsel %vm4935_vm9, %v1045_v1, %v3016_v19 }
  0xe7   : > { %v3024_v59 = vpop.permute.xlu1 %3023  ;;  %v1063_v22 = vsel %vm4935_vm9, %v1042_v23, %v3010_v50  ;;  %v1064_v35 = vsel %vm4935_vm9, %v1043_v24, %v3011_v11  ;;  %v3517_v11 = vld [vmem:[%s3641_s30 + $0x98] sm:$0xff] }
  0xe8   : > { %v3019_v60 = vpop.permute.xlu0 %3018  ;;  %v3026_v10 = vunpack.i.h.bf16 %v3024_v59  ;;  %v3025_v40 = vunpack.i.l.bf16 %v3024_v59 }
  0xe9   : > { %v3021_v61 = vunpack.i.h.bf16 %v3019_v60  ;;  %v3020_v25 = vunpack.i.l.bf16 %v3019_v60 }
  0xea   : > { %v942_v50 = vsel %vm928_vm3, %v3517_v11, %v3026_v10  ;;  %v941_v27 = vsel %vm928_vm3, %v3518_v57, %v3025_v40 }
  0xeb   : > { %v1084_v44 = vsel %vm4934_vm10, %v1063_v22, %v3020_v25  ;;  %v1085_v53 = vsel %vm4934_vm10, %v1064_v35, %v3021_v61  ;;  %v3034_v6 = vpop.permute.xlu1 %3033 }
  0xec   : > { %v1100_v36 = vpack.c.bf16 %v1085_v53, %v1084_v44  ;;  %v3029_v5 = vpop.permute.xlu0 %3028  ;;  %v3036_v17 = vunpack.i.h.bf16 %v3034_v6  ;;  %v3035_v46 = vunpack.i.l.bf16 %v3034_v6 }
  0xed   : > { %v3031_v28 = vunpack.i.h.bf16 %v3029_v5  ;;  %v3030_v0 = vunpack.i.l.bf16 %v3029_v5 }
  0xee   : > { %2697 = vmatprep.mubr.msk.bf16.mxu0 %vm4933_vm11, %v1100_v36  ;;  %v944_v37 = vsel %vm928_vm3, %v3775_v21, %v3036_v17  ;;  %v943_v38 = vsel %vm928_vm3, %v3772_v20, %v3035_v46 }
  0xef   : > { %v1087_v43 = vsel %vm4934_vm10, %v1066_v52, %v3031_v28  ;;  %v1086_v26 = vsel %vm4934_vm10, %v1065_v39, %v3030_v0  ;;  %v3044_v13 = vpop.permute.xlu1 %3043 }
  0xf0   : > { %v1101_v4 = vpack.c.bf16 %v1087_v43, %v1086_v26  ;;  %v3039_v2 = vpop.permute.xlu0 %3038  ;;  %v3046_v7 = vunpack.i.h.bf16 %v3044_v13  ;;  %v3045_v30 = vunpack.i.l.bf16 %v3044_v13 }
  0xf1   : > { %v3041_v63 = vunpack.i.h.bf16 %v3039_v2  ;;  %v3040_v45 = vunpack.i.l.bf16 %v3039_v2 }
  0xf2   : > { %2698 = vmatmul.mubr.msk.bf16.gmra.mrb[8].mxu0 %vm4933_vm11, %v1101_v4  ;;  %v964_v47 = vsel %vm949_vm4, %v943_v38, %v3045_v30  ;;  %v965_v21 = vsel %vm949_vm4, %v944_v37, %v3046_v7  ;;  %v3571_v38 = vmov 0.0  }
  0xf3   : > { %v3054_v49 = vpop.permute.xlu1 %3053  ;;  %v963_v20 = vsel %vm949_vm4, %v942_v50, %v3041_v63  ;;  %v962_v58 = vsel %vm949_vm4, %v941_v27, %v3040_v45  ;;  %1442 = vst.msk [vmem:[#allocation2 + $0x18] sm:$0xff] %vm928_vm3, %v3571_v38  ;;  %1443 = vst.msk [vmem:[#allocation2 + $0x20] sm:$0xff] %vm928_vm3, %v3571_v38 }
  0xf4   : > { %v3049_v56 = vpop.permute.xlu0 %3048  ;;  %v3056_v62 = vunpack.i.h.bf16 %v3054_v49  ;;  %v3055_v9 = vunpack.i.l.bf16 %v3054_v49  ;;  %1438 = vst.msk [vmem:[#allocation2] sm:$0xff] %vm928_vm3, %v3571_v38  ;;  %1439 = vst.msk [vmem:[#allocation2 + $0x8] sm:$0xff] %vm928_vm3, %v3571_v38 }
  0xf5   : > { %v3051_v34 = vunpack.i.h.bf16 %v3049_v56  ;;  %v3050_v29 = vunpack.i.l.bf16 %v3049_v56  ;;  %1445 = vst.msk [vmem:[#allocation2 + $0x30] sm:$0xff] %vm928_vm3, %v3571_v38  ;;  %1446 = vst.msk [vmem:[#allocation2 + $0x38] sm:$0xff] %vm928_vm3, %v3571_v38 }
  0xf6   : > { %v985_v51 = vsel %vm970_vm5, %v964_v47, %v3055_v9  ;;  %v986_v31 = vsel %vm970_vm5, %v965_v21, %v3056_v62  ;;  %1448 = vst.msk [vmem:[#allocation2 + $0x48] sm:$0xff] %vm928_vm3, %v3571_v38  ;;  %1449 = vst.msk [vmem:[#allocation2 + $0x50] sm:$0xff] %vm928_vm3, %v3571_v38 }
  0xf7   : > { %v4206_v14 = vpop.permute.xlu1 %3063  ;;  %v983_v61 = vsel %vm970_vm5, %v962_v58, %v3050_v29  ;;  %v984_v25 = vsel %vm970_vm5, %v963_v20, %v3051_v34  ;;  %1451 = vst.msk [vmem:[#allocation2 + $0x60] sm:$0xff] %vm928_vm3, %v3571_v38  ;;  %1452 = vst.msk [vmem:[#allocation2 + $0x68] sm:$0xff] %vm928_vm3, %v3571_v38 }
  0xf8   : > { %v3059_v33 = vpop.permute.xlu0 %3058  ;;  %v3066_v22 = vunpack.i.h.bf16 %v4206_v14  ;;  %v3065_v35 = vunpack.i.l.bf16 %v4206_v14  ;;  %1454 = vst.msk [vmem:[#allocation2 + $0x78] sm:$0xff] %vm928_vm3, %v3571_v38  ;;  %1455 = vst.msk [vmem:[#allocation2 + $0x80] sm:$0xff] %vm928_vm3, %v3571_v38 }
  0xf9   : > { %v3061_v18 = vunpack.i.h.bf16 %v3059_v33  ;;  %v3060_v8 = vunpack.i.l.bf16 %v3059_v33  ;;  %1457 = vst.msk [vmem:[#allocation2 + $0x90] sm:$0xff] %vm928_vm3, %v3571_v38  ;;  %1458 = vst.msk [vmem:[#allocation2 + $0x98] sm:$0xff] %vm928_vm3, %v3571_v38 }
  0xfa   : > { %v1006_v49 = vsel %vm991_vm6, %v985_v51, %v3065_v35  ;;  %v1007_v56 = vsel %vm991_vm6, %v986_v31, %v3066_v22  ;;  %1460 = vst.msk [vmem:[#allocation2 + $0xa8] sm:$0xff] %vm928_vm3, %v3571_v38  ;;  %1461 = vst.msk [vmem:[#allocation2 + $0xb0] sm:$0xff] %vm928_vm3, %v3571_v38  ;;  %v3521_v35 = vld [vmem:[%s3641_s30 + $0xc8] sm:$0xff] }
  0xfb   : > { %v4208_v12 = vpop.permute.xlu1 %3073  ;;  %v1004_v44 = vsel %vm991_vm6, %v983_v61, %v3060_v8  ;;  %v1005_v53 = vsel %vm991_vm6, %v984_v25, %v3061_v18  ;;  %1463 = vst.msk [vmem:[#allocation2 + $0xc0] sm:$0xff] %vm928_vm3, %v3571_v38  ;;  %1464 = vst.msk [vmem:[#allocation2 + $0xc8] sm:$0xff] %vm928_vm3, %v3571_v38 }
  0xfc   : > { %v3069_v15 = vpop.permute.xlu0 %3068  ;;  %v3076_v32 = vunpack.i.h.bf16 %v4208_v12  ;;  %v3075_v42 = vunpack.i.l.bf16 %v4208_v12  ;;  %1466 = vst.msk [vmem:[#allocation2 + $0xd8] sm:$0xff] %vm928_vm3, %v3571_v38  ;;  %1467 = vst.msk [vmem:[#allocation2 + $0xe0] sm:$0xff] %vm928_vm3, %v3571_v38 }
  0xfd   : > { %v3071_v59 = vunpack.i.h.bf16 %v3069_v15  ;;  %v3070_v60 = vunpack.i.l.bf16 %v3069_v15  ;;  %1444 = vst.msk [vmem:[#allocation2 + $0x28] sm:$0x3] %vm1440_vm12, %v3571_v38  ;;  %1441 = vst.msk [vmem:[#allocation2 + $0x10] sm:$0x3] %vm1440_vm12, %v3571_v38 }
  0xfe   : > { %v1027_v17 = vsel %vm1012_vm7, %v1006_v49, %v3075_v42  ;;  %v1028_v46 = vsel %vm1012_vm7, %v1007_v56, %v3076_v32  ;;  %1447 = vst.msk [vmem:[#allocation2 + $0x40] sm:$0x3] %vm1440_vm12, %v3571_v38  ;;  %1450 = vst.msk [vmem:[#allocation2 + $0x58] sm:$0x3] %vm1440_vm12, %v3571_v38 }
  0xff   : > { %v3084_v55 = vpop.permute.xlu1 %3083  ;;  %v1025_v36 = vsel %vm1012_vm7, %v1004_v44, %v3070_v60  ;;  %v1026_v6 = vsel %vm1012_vm7, %v1005_v53, %v3071_v59  ;;  %1453 = vst.msk [vmem:[#allocation2 + $0x70] sm:$0x3] %vm1440_vm12, %v3571_v38  ;;  %1456 = vst.msk [vmem:[#allocation2 + $0x88] sm:$0x3] %vm1440_vm12, %v3571_v38  ;;  %v3519_v60 = vld [vmem:[%s3641_s30 + $0xe0] sm:$0xff] }
 0x100   : > { %v3079_v16 = vpop.permute.xlu0 %3078  ;;  %v3086_v5 = vunpack.i.h.bf16 %v3084_v55  ;;  %v3085_v54 = vunpack.i.l.bf16 %v3084_v55  ;;  %1459 = vst.msk [vmem:[#allocation2 + $0xa0] sm:$0x3] %vm1440_vm12, %v3571_v38  ;;  %1462 = vst.msk [vmem:[#allocation2 + $0xb8] sm:$0x3] %vm1440_vm12, %v3571_v38 }
 0x101   : > { %v3081_v19 = vunpack.i.h.bf16 %v3079_v16  ;;  %v3080_v3 = vunpack.i.l.bf16 %v3079_v16  ;;  %1465 = vst.msk [vmem:[#allocation2 + $0xd0] sm:$0x3] %vm1440_vm12, %v3571_v38  ;;  %1468 = vst.msk [vmem:[#allocation2 + $0xe8] sm:$0x3] %vm1440_vm12, %v3571_v38 }
 0x102   : > { %v1048_v40 = vsel %vm1033_vm8, %v1027_v17, %v3085_v54  ;;  %v1049_v7 = vsel %vm1033_vm8, %v1028_v46, %v3086_v5 }
 0x103   : > { %v4224_v23 = vpop.permute.xlu1 %3093  ;;  %v1046_v0 = vsel %vm1033_vm8, %v1025_v36, %v3080_v3  ;;  %v1047_v39 = vsel %vm1033_vm8, %v1026_v6, %v3081_v19 }
 0x104   : > { %v3089_v24 = vpop.permute.xlu0 %3088  ;;  %v3096_v26 = vunpack.i.h.bf16 %v4224_v23  ;;  %v3095_v4 = vunpack.i.l.bf16 %v4224_v23 }
 0x105   : > { %v3091_v41 = vunpack.i.h.bf16 %v3089_v24  ;;  %v3090_v48 = vunpack.i.l.bf16 %v3089_v24  ;;  %v3520_v24 = vld [vmem:[%s3641_s30 + $0xd8] sm:$0xff] }
 0x106   : > { %v1069_v63 = vsel %vm4935_vm9, %v1048_v40, %v3095_v4  ;;  %v1070_v45 = vsel %vm4935_vm9, %v1049_v7, %v3096_v26 }
 0x107   : > { %v4236_v1 = vpop.permute.xlu1 %3103  ;;  %v1067_v13 = vsel %vm4935_vm9, %v1046_v0, %v3090_v48  ;;  %v1068_v2 = vsel %vm4935_vm9, %v1047_v39, %v3091_v41  ;;  %v3522_v48 = vld [vmem:[%s3641_s30 + $0xc0] sm:$0xff]  ;;  %s4323_s30 = sshll.u32 %s3545_s18, 3 }
 0x108   : > { %v3099_v28 = vpop.permute.xlu0 %3098  ;;  %v3106_v21 = vunpack.i.h.bf16 %v4236_v1  ;;  %v3105_v20 = vunpack.i.l.bf16 %v4236_v1  ;;  %s2634_s10 = sadd.s32 4294967295, %s4323_s30  ;;  %p242_p6 = scmp.lt.s32.totalorder %s4323_s30, 15 }
 0x109   : > { %v3101_v52 = vunpack.i.h.bf16 %v3099_v28  ;;  %v3100_v43 = vunpack.i.l.bf16 %v3099_v28 }
 0x10a   : > { %v946_v41 = vsel %vm928_vm3, %v3521_v35, %v3106_v21  ;;  %v945_v44 = vsel %vm928_vm3, %v3522_v48, %v3105_v20  ;;  %s5002_s30 = smov (!%p242_p6, %s4323_s30), 15 }
 0x10b   : > { %v1088_v14 = vsel %vm4934_vm10, %v1067_v13, %v3100_v43  ;;  %v1089_v33 = vsel %vm4934_vm10, %v1068_v2, %v3101_v52  ;;  %v4250_v15 = vpop.permute.xlu1 %3113 }
 0x10c   : > { %v1102_v12 = vpack.c.bf16 %v1089_v33, %v1088_v14  ;;  %v3109_v10 = vpop.permute.xlu0 %3108  ;;  %v3116_v27 = vunpack.i.h.bf16 %v4250_v15  ;;  %v3115_v47 = vunpack.i.l.bf16 %v4250_v15 }
 0x10d   : > { %v3111_v30 = vunpack.i.h.bf16 %v3109_v10  ;;  %v3110_v37 = vunpack.i.l.bf16 %v3109_v10 }
 0x10e   : > { %2701 = vmatprep.mubr.msk.bf16.mxu0 %vm4933_vm11, %v1102_v12  ;;  %v948_v23 = vsel %vm928_vm3, %v3519_v60, %v3116_v27  ;;  %v947_v61 = vsel %vm928_vm3, %v3520_v24, %v3115_v47 }
 0x10f   : > { %v1091_v62 = vsel %vm4934_vm10, %v1070_v45, %v3111_v30  ;;  %v1090_v9 = vsel %vm4934_vm10, %v1069_v63, %v3110_v37  ;;  %v3124_v16 = vpop.permute.xlu1 %3123 }
 0x110   : > { %v1103_v55 = vpack.c.bf16 %v1091_v62, %v1090_v9  ;;  %v3119_v34 = vpop.permute.xlu0 %3118  ;;  %v3126_v58 = vunpack.i.h.bf16 %v3124_v16  ;;  %v3125_v18 = vunpack.i.l.bf16 %v3124_v16 }
 0x111   : > { %v3121_v8 = vunpack.i.h.bf16 %v3119_v34  ;;  %v3120_v51 = vunpack.i.l.bf16 %v3119_v34 }
 0x112   : > { %2702 = vmatmul.mubr.msk.bf16.gmra.mrb[12].mxu0 %vm4933_vm11, %v1103_v55  ;;  %v968_v53 = vsel %vm949_vm4, %v947_v61, %v3125_v18  ;;  %v969_v32 = vsel %vm949_vm4, %v948_v23, %v3126_v58 }
 0x113   : > { %v3134_v29 = vpop.permute.xlu1 %3133  ;;  %v967_v42 = vsel %vm949_vm4, %v946_v41, %v3121_v8  ;;  %v966_v36 = vsel %vm949_vm4, %v945_v44, %v3120_v51 }
 0x114   : > { %v3129_v11 = vpop.permute.xlu0 %3128  ;;  %v3136_v25 = vunpack.i.h.bf16 %v3134_v29  ;;  %v3135_v19 = vunpack.i.l.bf16 %v3134_v29 }
 0x115   : > { %v3131_v3 = vunpack.i.h.bf16 %v3129_v11  ;;  %v3130_v22 = vunpack.i.l.bf16 %v3129_v11 }
 0x116   : > { %v989_v39 = vsel %vm970_vm5, %v968_v53, %v3135_v19  ;;  %v990_v52 = vsel %vm970_vm5, %v969_v32, %v3136_v25  ;;  %v4326_v25 = vstv %s2634_s10  ;;  %v3512_v32 = vld [vmem:[%s4930_s3] sm:$0xff]  }
 0x117   : > { %v3144_v50 = vpop.permute.xlu1 %3143  ;;  %v987_v43 = vsel %vm970_vm5, %v966_v36, %v3130_v22  ;;  %v988_v26 = vsel %vm970_vm5, %v967_v42, %v3131_v3  ;;  %v1359_v19 = vadd.s32 1, %v4326_v25  ;;  %v4332_v3 = vld [vmem:[%s4929_s2] ss:$0 sm:$0xff]  ;;  %vm1368_vm15 = vcmp.ge.s32.totalorder %v4326_v25, 0  ;;  %2709 = vmatprep.subr.bf16.mxu1 %v3512_v32 }
 0x118   : > { %v3139_v57 = vpop.permute.xlu0 %3138  ;;  %v3146_v54 = vunpack.i.h.bf16 %v3144_v50  ;;  %v3145_v1 = vunpack.i.l.bf16 %v3144_v50  ;;  %vm1378_vm0 = vcmp.lt.s32.totalorder %v4326_v25, 16  ;;  %2710 = vmatpush3.bf16.msra.mxu1 %v3512_v32 }
 0x119   : > { %v3141_v28 = vunpack.i.h.bf16 %v3139_v57  ;;  %v3140_v0 = vunpack.i.l.bf16 %v3139_v57  ;;  %vm1369_vm13 = vcmp.ge.s32.totalorder %v1359_v19, 0  ;;  %vm1379_vm14 = vcmp.lt.s32.totalorder %v1359_v19, 16 }
 0x11a   : > { %v1010_v15 = vsel %vm991_vm6, %v989_v39, %v3145_v1  ;;  %v1011_v10 = vsel %vm991_vm6, %v990_v52, %v3146_v54  ;;  %vm4338_vm12 = vmand %vm1369_vm13, %vm1379_vm14 }
 0x11b   : > { %v3154_v31 = vpop.permute.xlu1 %3153  ;;  %v1008_v40 = vsel %vm991_vm6, %v987_v43, %v3140_v0  ;;  %v1009_v7 = vsel %vm991_vm6, %v988_v26, %v3141_v28 }
 0x11c   : > { %v3149_v59 = vpop.permute.xlu0 %3148  ;;  %v3156_v4 = vunpack.i.h.bf16 %v3154_v31  ;;  %v3155_v13 = vunpack.i.l.bf16 %v3154_v31 }
 0x11d   : > { %v3151_v2 = vunpack.i.h.bf16 %v3149_v59  ;;  %v3150_v49 = vunpack.i.l.bf16 %v3149_v59 }
 0x11e   : > { %v1031_v45 = vsel %vm1012_vm7, %v1010_v15, %v3155_v13  ;;  %v1032_v62 = vsel %vm1012_vm7, %v1011_v10, %v3156_v4 }
 0x11f   : > { %v3164_v6 = vpop.permute.xlu1 %3163  ;;  %v1029_v9 = vsel %vm1012_vm7, %v1008_v40, %v3150_v49  ;;  %v1030_v55 = vsel %vm1012_vm7, %v1009_v7, %v3151_v2  ;;  %v1361_v7 = vadd.s32 3, %v4326_v25 }
 0x120   : > { %v3159_v5 = vpop.permute.xlu0 %3158  ;;  %v3166_v56 = vunpack.i.h.bf16 %v3164_v6  ;;  %v3165_v14 = vunpack.i.l.bf16 %v3164_v6 }
 0x121   : > { %v3161_v33 = vunpack.i.h.bf16 %v3159_v5  ;;  %v3160_v17 = vunpack.i.l.bf16 %v3159_v5  ;;  %v3514_v5 = vld [vmem:[%s4930_s3 + $0x10] sm:$0xff]  }
 0x122   : > { %v1052_v16 = vsel %vm1033_vm8, %v1031_v45, %v3165_v14  ;;  %v1053_v34 = vsel %vm1033_vm8, %v1032_v62, %v3166_v56 }
 0x123   : > { %v3174_v46 = vpop.permute.xlu1 %3173  ;;  %v1050_v29 = vsel %vm1033_vm8, %v1029_v9, %v3160_v17  ;;  %v1051_v11 = vsel %vm1033_vm8, %v1030_v55, %v3161_v33 }
 0x124   : > { %v3169_v12 = vpop.permute.xlu0 %3168  ;;  %v3176_v30 = vunpack.i.h.bf16 %v3174_v46  ;;  %v3175_v37 = vunpack.i.l.bf16 %v3174_v46 }
 0x125   : > { %v3171_v38 = vunpack.i.h.bf16 %v3169_v12  ;;  %v3170_v63 = vunpack.i.l.bf16 %v3169_v12 }
 0x126   : > { %v1073_v58 = vsel %vm4935_vm9, %v1052_v16, %v3175_v37  ;;  %v1074_v18 = vsel %vm4935_vm9, %v1053_v34, %v3176_v30  ;;  %v1360_v37 = vadd.s32 2, %v4326_v25 }
 0x127   : > { %v3184_v50 = vpop.permute.xlu1 %3183  ;;  %v1071_v8 = vsel %vm4935_vm9, %v1050_v29, %v3170_v63  ;;  %v1072_v51 = vsel %vm4935_vm9, %v1051_v11, %v3171_v38 }
 0x128   : > { %v3179_v57 = vpop.permute.xlu0 %3178  ;;  %v3186_v27 = vunpack.i.h.bf16 %v3184_v50  ;;  %v3185_v47 = vunpack.i.l.bf16 %v3184_v50  ;;  %vm1380_vm14 = vcmp.lt.s32.totalorder %v1360_v37, 16 }
 0x129   : > { %v3181_v21 = vunpack.i.h.bf16 %v3179_v57  ;;  %v3180_v20 = vunpack.i.l.bf16 %v3179_v57 }
 0x12a   : > { %v1094_v31 = vsel %vm4934_vm10, %v1073_v58, %v3185_v47  ;;  %v1095_v59 = vsel %vm4934_vm10, %v1074_v18, %v3186_v27 }
 0x12b   : > { %v1092_v60 = vsel %vm4934_vm10, %v1071_v8, %v3180_v20  ;;  %v1093_v23 = vsel %vm4934_vm10, %v1072_v51, %v3181_v21  ;;  %v1105_v24 = vpack.c.bf16 %v1095_v59, %v1094_v31  ;;  %vm4343_vm10 = vmand %vm1368_vm15, %vm1378_vm0 }
 0x12c   : > { %v1104_v61 = vpack.c.bf16 %v1093_v23, %v1092_v60 }
 0x12e   : > { %2705 = vmatprep.mubr.msk.bf16.mxu0 %vm4933_vm11, %v1104_v61 }
 0x12f   : > { %2706 = vmatmul.mubr.msk.bf16.gmra.mrb[16].mxu0 %vm4933_vm11, %v1105_v24 }
 0x185   : > { %v2691_v22 = vpop.f32.mrb[0].mxu0 }
 0x186   : > { %v1227_v35 = vadd.f32 %v2691_v22, %v4332_v3  ;;  %v1218_v41 = vpop.f32.mrb[1].mxu0 }
 0x187   : > { %v1219_v48 = vadd.f32 %v4332_v3, %v1218_v41  ;;  %v2692_v44 = vpop.f32.mrb[2].mxu0 }
 0x188   : > { %vm1299_vm1 = vcmp.gt.f32.partialorder %v1227_v35, 0.0  ;;  %v1319_v53 = vmul.f32 0.1, %v1227_v35  ;;  %v1230_v42 = vadd.f32 %v2692_v44, %v4332_v3  ;;  %v1221_v36 = vpop.f32.mrb[3].mxu0 }
 0x189   : > { %vm1297_vm11 = vcmp.gt.f32.partialorder %v1219_v48, 0.0  ;;  %v1317_v6 = vmul.f32 0.1, %v1219_v48  ;;  %v1222_v54 = vadd.f32 %v4332_v3, %v1221_v36 }
 0x18a   : > { %v1339_v1 = vsel %vm1299_vm1, %v1227_v35, %v1319_v53  ;;  %vm1300_vm9 = vcmp.gt.f32.partialorder %v1230_v42, 0.0  ;;  %v1320_v28 = vmul.f32 0.1, %v1230_v42 }
 0x18b   : > { %v1420_v0 = vsel %vm4338_vm12, %v1339_v1, 0.0  ;;  %v1337_v39 = vsel %vm1297_vm11, %v1219_v48, %v1317_v6  ;;  %vm1298_vm13 = vcmp.gt.f32.partialorder %v1222_v54, 0.0  ;;  %v1318_v52 = vmul.f32 0.1, %v1222_v54  ;;  %v3513_v6 = vld [vmem:[%s4930_s3 + $0x8] sm:$0xff]  }
 0x18c   : > { %1471 = vst.msk [vmem:[#allocation2 + $0x19] sm:$0xff] %vm928_vm3, %v1420_v0  ;;  %v1418_v43 = vsel %vm4343_vm10, %v1337_v39, 0.0  ;;  %v1340_v26 = vsel %vm1300_vm9, %v1230_v42, %v1320_v28  ;;  %vm1371_vm9 = vcmp.ge.s32.totalorder %v1361_v7, 0  ;;  %vm1370_vm11 = vcmp.ge.s32.totalorder %v1360_v37, 0  ;;  %2711 = vmatprep.subr.bf16.mxu1 %v3513_v6  ;;  %v3515_v0 = vld [vmem:[%s4930_s3 + $0x18] sm:$0xff]  }
 0x18d   : > { %1469 = vst.msk [vmem:[#allocation2 + $0x1] sm:$0xff] %vm928_vm3, %v1418_v43  ;;  %v1421_v4 = vsel %vm4338_vm12, %v1340_v26, 0.0  ;;  %v1338_v13 = vsel %vm1298_vm13, %v1222_v54, %v1318_v52  ;;  %vm4381_vm12 = vmand %vm1370_vm11, %vm1380_vm14  ;;  %2712 = vmatpush3.bf16.msra.mxu1 %v3513_v6  ;;  %v1363_v54 = vadd.s32 5, %v4326_v25  ;;  %v1362_v1 = vadd.s32 4, %v4326_v25 }
 0x18e   : > { %1472 = vst.msk [vmem:[#allocation2 + $0x21] sm:$0xff] %vm928_vm3, %v1421_v4  ;;  %v1419_v2 = vsel %vm4343_vm10, %v1338_v13, 0.0  ;;  %vm1381_vm10 = vcmp.lt.s32.totalorder %v1361_v7, 16  ;;  %2713 = vmatprep.subr.bf16.mxu1 %v3514_v5 }
 0x18f   : > { %1470 = vst.msk [vmem:[#allocation2 + $0x9] sm:$0xff] %vm928_vm3, %v1419_v2  ;;  %vm4376_vm0 = vmand %vm1371_vm9, %vm1381_vm10  ;;  %vm1373_vm10 = vcmp.ge.s32.totalorder %v1363_v54, 0  ;;  %vm1383_vm11 = vcmp.lt.s32.totalorder %v1363_v54, 16  ;;  %vm1372_vm14 = vcmp.ge.s32.totalorder %v1362_v1, 0 }
 0x191   : > { %2714 = vmatpush3.bf16.msra.mxu1 %v3514_v5 }
 0x192   : > { %2715 = vmatprep.subr.bf16.mxu1 %v3515_v0 }
 0x193   : > { %v4360_v49 = vld [vmem:[#allocation2 + $0x18] sm:$0xff] }
 0x194   : > { %v1507_v14 = vld [vmem:[#allocation2 + $0x19] sm:$0xff]  ;;  %v1505_v30 = vld [vmem:[#allocation2 + $0x1] sm:$0xff] }
 0x195   : > { %v4362_v56 = vld [vmem:[#allocation2 + $0x20] sm:$0xff]  ;;  %2716 = vmatpush3.bf16.msra.mxu1 %v3515_v0 }
 0x196   : > { %v1508_v33 = vld [vmem:[#allocation2 + $0x21] sm:$0xff]  ;;  %v3197_v17 = vpack.i.bf16 %v4362_v56, %v4360_v49  ;;  %v1506_v40 = vld [vmem:[#allocation2 + $0x9] sm:$0xff] }
 0x197   : > { %v3187_v46 = vpack.i.bf16 %v1508_v33, %v1507_v14  ;;  %v1523_v12 = vld [vmem:[#allocation2 + $0x1a] sm:$0xff]  ;;  %v1524_v15 = vld [vmem:[#allocation2 + $0x22] sm:$0xff]  ;;  %v3212_v38 = vpack.i.bf16 %v1506_v40, %v1505_v30  ;;  %v1522_v45 = vld [vmem:[#allocation2 + $0xa] sm:$0xff] }
 0x198   : > { %3198 = vrot.lane.b32.xlu0 %v3197_v17, %s3563_s6  ;;  %v3192_v10 = vpack.i.bf16 %v1524_v15, %v1523_v12  ;;  %v1521_v63 = vld [vmem:[#allocation2 + $0x2] sm:$0xff]  ;;  %v3516_v33 = vld [vmem:[%s4930_s3 + $0x20] ss:$0 sps:$4 sm:$0xff]  }
 0x199   : > { %3188 = vrot.lane.b32.xlu1 %v3187_v46, %s3565_s8  ;;  %v3217_v29 = vpack.i.bf16 %v1522_v45, %v1521_v63  ;;  %2736 = vmatprep.subr.msk.bf16.mxu1 %vm1180_vm2, %v3516_v33  ;;  %v2351_v37 = vsel %vm1180_vm2, %v3516_v33, 0 }
 0x19a   : > { %2718 = vmatpush3.bf16.msra.mxu1 %v2351_v37 }
 0x19c   : > { %3203 = vrot.lane.b32.xlu0 %v3187_v46, %s3566_s13 }
 0x19d   : > { %3193 = vrot.lane.b32.xlu1 %v3192_v10, %s3564_s7 }
 0x1a0   : > { %3208 = vrot.lane.b32.xlu0 %v3192_v10, %s3567_s16 }
 0x1a4   : > { %3213 = vrot.lane.b32.xlu0 %v3212_v38, %s3565_s8 }
 0x1a5   : > { %v2695_v62 = vpop.f32.mrb[4].mxu0 }
 0x1a6   : > { %v1243_v9 = vadd.f32 %v2695_v62, %v4332_v3  ;;  %v1234_v55 = vpop.f32.mrb[5].mxu0 }
 0x1a7   : > { %v1235_v16 = vadd.f32 %v4332_v3, %v1234_v55  ;;  %v2696_v34 = vpop.f32.mrb[6].mxu0 }
 0x1a8   : > { %vm1303_vm15 = vcmp.gt.f32.partialorder %v1243_v9, 0.0  ;;  %v1323_v11 = vmul.f32 0.1, %v1243_v9  ;;  %v1246_v57 = vadd.f32 %v2696_v34, %v4332_v3  ;;  %v1237_v27 = vpop.f32.mrb[7].mxu0  ;;  %3218 = vrot.lane.b32.xlu0 %v3217_v29, %s3564_s7 }
 0x1a9   : > { %vm1301_vm1 = vcmp.gt.f32.partialorder %v1235_v16, 0.0  ;;  %v1321_v47 = vmul.f32 0.1, %v1235_v16  ;;  %v1238_v20 = vadd.f32 %v4332_v3, %v1237_v27 }
 0x1aa   : > { %v1343_v58 = vsel %vm1303_vm15, %v1243_v9, %v1323_v11  ;;  %vm1304_vm13 = vcmp.gt.f32.partialorder %v1246_v57, 0.0  ;;  %v1324_v18 = vmul.f32 0.1, %v1246_v57  ;;  %vm1382_vm15 = vcmp.lt.s32.totalorder %v1362_v1, 16 }
 0x1ab   : > { %v1424_v8 = vsel %vm4376_vm0, %v1343_v58, 0.0  ;;  %v1341_v51 = vsel %vm1301_vm1, %v1235_v16, %v1321_v47  ;;  %vm1302_vm9 = vcmp.gt.f32.partialorder %v1238_v20, 0.0  ;;  %v1322_v31 = vmul.f32 0.1, %v1238_v20  ;;  %vm4440_vm1 = vmand %vm1373_vm10, %vm1383_vm11 }
 0x1ac   : > { %1475 = vst.msk [vmem:[#allocation2 + $0x49] sm:$0xff] %vm928_vm3, %v1424_v8  ;;  %v1422_v59 = vsel %vm4381_vm12, %v1341_v51, 0.0  ;;  %v1344_v60 = vsel %vm1304_vm13, %v1246_v57, %v1324_v18  ;;  %vm4449_vm13 = vmand %vm1372_vm14, %vm1382_vm15 }
 0x1ad   : > { %1473 = vst.msk [vmem:[#allocation2 + $0x31] sm:$0xff] %vm928_vm3, %v1422_v59  ;;  %v1425_v23 = vsel %vm4376_vm0, %v1344_v60, 0.0  ;;  %v1342_v24 = vsel %vm1302_vm9, %v1238_v20, %v1322_v31 }
 0x1ae   : > { %1476 = vst.msk [vmem:[#allocation2 + $0x51] sm:$0xff] %vm928_vm3, %v1425_v23  ;;  %v1423_v61 = vsel %vm4381_vm12, %v1342_v24, 0.0  ;;  %v1365_v23 = vadd.s32 7, %v4326_v25  ;;  %v1364_v24 = vadd.s32 6, %v4326_v25 }
 0x1af   : > { %1474 = vst.msk [vmem:[#allocation2 + $0x39] sm:$0xff] %vm928_vm3, %v1423_v61 }
 0x1b0   : > { %vm1375_vm2 = vcmp.ge.s32.totalorder %v1365_v23, 0  ;;  %vm1385_vm11 = vcmp.lt.s32.totalorder %v1365_v23, 16  ;;  %vm1374_vm14 = vcmp.ge.s32.totalorder %v1364_v24, 0  ;;  %vm1384_vm15 = vcmp.lt.s32.totalorder %v1364_v24, 16 }
 0x1b3   : > { %v4399_v19 = vld [vmem:[#allocation2 + $0x48] sm:$0xff] }
 0x1b4   : > { %v1605_v42 = vld [vmem:[#allocation2 + $0x49] sm:$0xff]  ;;  %v1556_v30 = vld [vmem:[#allocation2 + $0x31] sm:$0xff] }
 0x1b5   : > { %v4401_v22 = vld [vmem:[#allocation2 + $0x50] sm:$0xff] }
 0x1b6   : > { %v1621_v35 = vld [vmem:[#allocation2 + $0x4a] sm:$0xff]  ;;  %v1622_v41 = vld [vmem:[#allocation2 + $0x52] sm:$0xff]  ;;  %v3222_v48 = vpack.i.bf16 %v4401_v22, %v4399_v19  ;;  %v1573_v34 = vld [vmem:[#allocation2 + $0x3a] sm:$0xff] }
 0x1b7   : > { %v3232_v44 = vpack.i.bf16 %v1622_v41, %v1621_v35  ;;  %v1606_v53 = vld [vmem:[#allocation2 + $0x51] sm:$0xff]  ;;  %v1557_v14 = vld [vmem:[#allocation2 + $0x39] sm:$0xff] }
 0x1b8   : > { %3223 = vrot.lane.b32.xlu1 %v3222_v48, %s3568_s26  ;;  %v3227_v36 = vpack.i.bf16 %v1606_v53, %v1605_v42  ;;  %v4422_v28 = vld [vmem:[#allocation2 + $0x38] sm:$0xff]  ;;  %v4429_v52 = vld [vmem:[#allocation2 + $0x30] sm:$0xff]  ;;  %v3267_v45 = vpack.i.bf16 %v1557_v14, %v1556_v30 }
 0x1b9   : > { %3233 = vrot.lane.b32.xlu0 %v3232_v44, %s3570_s28  ;;  %v3262_v4 = vpack.i.bf16 %v4422_v28, %v4429_v52  ;;  %v1572_v16 = vld [vmem:[#allocation2 + $0x32] sm:$0xff] }
 0x1ba   : > { %v3272_v47 = vpack.i.bf16 %v1573_v34, %v1572_v16 }
 0x1bc   : > { %3228 = vrot.lane.b32.xlu1 %v3227_v36, %s3569_s27 }
 0x1bd   : > { %3248 = vrot.lane.b32.xlu0 %v3222_v48, %s3563_s6 }
 0x1c0   : > { %3238 = vrot.lane.b32.xlu1 %v3227_v36, %s3565_s8 }
 0x1c1   : > { %3253 = vrot.lane.b32.xlu0 %v3227_v36, %s3566_s13 }
 0x1c4   : > { %3243 = vrot.lane.b32.xlu1 %v3232_v44, %s3564_s7 }
 0x1c5   : > { %3258 = vrot.lane.b32.xlu0 %v3232_v44, %s3567_s16  ;;  %v2699_v39 = vpop.f32.mrb[8].mxu0 }
 0x1c6   : > { %v1259_v43 = vadd.f32 %v2699_v39, %v4332_v3  ;;  %v1250_v26 = vpop.f32.mrb[9].mxu0 }
 0x1c7   : > { %v1251_v13 = vadd.f32 %v4332_v3, %v1250_v26  ;;  %v2700_v2 = vpop.f32.mrb[10].mxu0 }
 0x1c8   : > { %vm1307_vm0 = vcmp.gt.f32.partialorder %v1259_v43, 0.0  ;;  %v1327_v17 = vmul.f32 0.1, %v1259_v43  ;;  %v1262_v12 = vadd.f32 %v2700_v2, %v4332_v3  ;;  %v1253_v15 = vpop.f32.mrb[11].mxu0  ;;  %3263 = vrot.lane.b32.xlu1 %v3262_v4, %s3563_s6 }
 0x1c9   : > { %3278 = vrot.lane.b32.xlu0 %v3262_v4, %s3568_s26  ;;  %vm1305_vm12 = vcmp.gt.f32.partialorder %v1251_v13, 0.0  ;;  %v1325_v10 = vmul.f32 0.1, %v1251_v13  ;;  %v1254_v7 = vadd.f32 %v4332_v3, %v1253_v15 }
 0x1ca   : > { %v1347_v38 = vsel %vm1307_vm0, %v1259_v43, %v1327_v17  ;;  %vm1308_vm9 = vcmp.gt.f32.partialorder %v1262_v12, 0.0  ;;  %v1328_v63 = vmul.f32 0.1, %v1262_v12 }
 0x1cb   : > { %v1428_v62 = vsel %vm4440_vm1, %v1347_v38, 0.0  ;;  %v1345_v9 = vsel %vm1305_vm12, %v1251_v13, %v1325_v10  ;;  %vm1306_vm10 = vcmp.gt.f32.partialorder %v1254_v7, 0.0  ;;  %v1326_v55 = vmul.f32 0.1, %v1254_v7 }
 0x1cc   : > { %1479 = vst.msk [vmem:[#allocation2 + $0x79] sm:$0xff] %vm928_vm3, %v1428_v62  ;;  %v1426_v29 = vsel %vm4449_vm13, %v1345_v9, 0.0  ;;  %v1348_v11 = vsel %vm1308_vm9, %v1262_v12, %v1328_v63  ;;  %3268 = vrot.lane.b32.xlu1 %v3267_v45, %s3566_s13 }
 0x1cd   : > { %3283 = vrot.lane.b32.xlu0 %v3267_v45, %s3569_s27  ;;  %1477 = vst.msk [vmem:[#allocation2 + $0x61] sm:$0xff] %vm928_vm3, %v1426_v29  ;;  %v1429_v50 = vsel %vm4440_vm1, %v1348_v11, 0.0  ;;  %v1346_v57 = vsel %vm1306_vm10, %v1254_v7, %v1326_v55  ;;  %vm4498_vm1 = vmand %vm1375_vm2, %vm1385_vm11  ;;  %v1367_v11 = vadd.s32 9, %v4326_v25 }
 0x1ce   : > { %1480 = vst.msk [vmem:[#allocation2 + $0x81] sm:$0xff] %vm928_vm3, %v1429_v50  ;;  %v1427_v27 = vsel %vm4449_vm13, %v1346_v57, 0.0  ;;  %vm4506_vm13 = vmand %vm1374_vm14, %vm1384_vm15  ;;  %v1366_v50 = vadd.s32 8, %v4326_v25 }
 0x1cf   : > { %1478 = vst.msk [vmem:[#allocation2 + $0x69] sm:$0xff] %vm928_vm3, %v1427_v27  ;;  %vm1377_vm2 = vcmp.ge.s32.totalorder %v1367_v11, 0  ;;  %vm1387_vm11 = vcmp.lt.s32.totalorder %v1367_v11, 16 }
 0x1d0   : > { %3273 = vrot.lane.b32.xlu1 %v3272_v47, %s3567_s16  ;;  %vm1376_vm14 = vcmp.ge.s32.totalorder %v1366_v50, 0  ;;  %vm1386_vm15 = vcmp.lt.s32.totalorder %v1366_v50, 16 }
 0x1d1   : > { %3288 = vrot.lane.b32.xlu0 %v3272_v47, %s3570_s28 }
 0x1d3   : > { %v4474_v21 = vld [vmem:[#allocation2 + $0x78] sm:$0xff] }
 0x1d4   : > { %3293 = vrot.lane.b32.xlu1 %v3267_v45, %s3565_s8  ;;  %v1609_v59 = vld [vmem:[#allocation2 + $0x79] sm:$0xff]  ;;  %v1560_v26 = vld [vmem:[#allocation2 + $0x61] sm:$0xff] }
 0x1d5   : > { %3298 = vrot.lane.b32.xlu0 %v3272_v47, %s3564_s7  ;;  %v4476_v20 = vld [vmem:[#allocation2 + $0x80] sm:$0xff] }
 0x1d6   : > { %v1625_v58 = vld [vmem:[#allocation2 + $0x7a] sm:$0xff]  ;;  %v1626_v18 = vld [vmem:[#allocation2 + $0x82] sm:$0xff]  ;;  %v3302_v8 = vpack.i.bf16 %v4476_v20, %v4474_v21  ;;  %v1577_v12 = vld [vmem:[#allocation2 + $0x6a] sm:$0xff] }
 0x1d7   : > { %v3312_v51 = vpack.i.bf16 %v1626_v18, %v1625_v58  ;;  %v1610_v31 = vld [vmem:[#allocation2 + $0x81] sm:$0xff]  ;;  %v1561_v36 = vld [vmem:[#allocation2 + $0x69] sm:$0xff] }
 0x1d8   : > { %3303 = vrot.lane.b32.xlu1 %v3302_v8, %s3568_s26  ;;  %v3307_v60 = vpack.i.bf16 %v1610_v31, %v1609_v59  ;;  %v4488_v61 = vld [vmem:[#allocation2 + $0x68] sm:$0xff]  ;;  %v4492_v41 = vld [vmem:[#allocation2 + $0x60] sm:$0xff]  ;;  %v3347_v2 = vpack.i.bf16 %v1561_v36, %v1560_v26 }
 0x1d9   : > { %3313 = vrot.lane.b32.xlu0 %v3312_v51, %s3570_s28  ;;  %v3342_v53 = vpack.i.bf16 %v4488_v61, %v4492_v41  ;;  %v1576_v46 = vld [vmem:[#allocation2 + $0x62] sm:$0xff] }
 0x1da   : > { %v3352_v37 = vpack.i.bf16 %v1577_v12, %v1576_v46 }
 0x1dc   : > { %3308 = vrot.lane.b32.xlu1 %v3307_v60, %s3569_s27 }
 0x1dd   : > { %3328 = vrot.lane.b32.xlu0 %v3302_v8, %s3563_s6 }
 0x1e0   : > { %3318 = vrot.lane.b32.xlu1 %v3307_v60, %s3565_s8 }
 0x1e1   : > { %3333 = vrot.lane.b32.xlu0 %v3307_v60, %s3566_s13 }
 0x1e4   : > { %3323 = vrot.lane.b32.xlu1 %v3312_v51, %s3564_s7 }
 0x1e5   : > { %3338 = vrot.lane.b32.xlu0 %v3312_v51, %s3567_s16  ;;  %v2703_v35 = vpop.f32.mrb[12].mxu0 }
 0x1e6   : > { %v1275_v48 = vadd.f32 %v2703_v35, %v4332_v3  ;;  %v1266_v44 = vpop.f32.mrb[13].mxu0 }
 0x1e7   : > { %v1267_v32 = vadd.f32 %v4332_v3, %v1266_v44  ;;  %v2704_v42 = vpop.f32.mrb[14].mxu0 }
 0x1e8   : > { %vm1311_vm0 = vcmp.gt.f32.partialorder %v1275_v48, 0.0  ;;  %v1331_v6 = vmul.f32 0.1, %v1275_v48  ;;  %v1278_v54 = vadd.f32 %v2704_v42, %v4332_v3  ;;  %v1269_v1 = vpop.f32.mrb[15].mxu0  ;;  %3343 = vrot.lane.b32.xlu1 %v3342_v53, %s3563_s6 }
 0x1e9   : > { %3358 = vrot.lane.b32.xlu0 %v3342_v53, %s3568_s26  ;;  %vm1309_vm12 = vcmp.gt.f32.partialorder %v1267_v32, 0.0  ;;  %v1329_v0 = vmul.f32 0.1, %v1267_v32  ;;  %v1270_v43 = vadd.f32 %v4332_v3, %v1269_v1 }
 0x1ea   : > { %v1351_v4 = vsel %vm1311_vm0, %v1275_v48, %v1331_v6  ;;  %vm1312_vm9 = vcmp.gt.f32.partialorder %v1278_v54, 0.0  ;;  %v1332_v13 = vmul.f32 0.1, %v1278_v54 }
 0x1eb   : > { %v1432_v14 = vsel %vm4498_vm1, %v1351_v4, 0.0  ;;  %v1349_v33 = vsel %vm1309_vm12, %v1267_v32, %v1329_v0  ;;  %vm1310_vm10 = vcmp.gt.f32.partialorder %v1270_v43, 0.0  ;;  %v1330_v17 = vmul.f32 0.1, %v1270_v43 }
 0x1ec   : > { %1483 = vst.msk [vmem:[#allocation2 + $0xa9] sm:$0xff] %vm928_vm3, %v1432_v14  ;;  %v1430_v15 = vsel %vm4506_vm13, %v1349_v33, 0.0  ;;  %v1352_v10 = vsel %vm1312_vm9, %v1278_v54, %v1332_v13  ;;  %3348 = vrot.lane.b32.xlu1 %v3347_v2, %s3566_s13 }
 0x1ed   : > { %3363 = vrot.lane.b32.xlu0 %v3347_v2, %s3569_s27  ;;  %1481 = vst.msk [vmem:[#allocation2 + $0x91] sm:$0xff] %vm928_vm3, %v1430_v15  ;;  %v1433_v40 = vsel %vm4498_vm1, %v1352_v10, 0.0  ;;  %v1350_v7 = vsel %vm1310_vm10, %v1270_v43, %v1330_v17  ;;  %vm4549_vm1 = vmand %vm1377_vm2, %vm1387_vm11  ;;  %vm4956_vm2 = vcmask 457728  }
 0x1ee   : > { %1484 = vst.msk [vmem:[#allocation2 + $0xb1] sm:$0xff] %vm928_vm3, %v1433_v40  ;;  %v1431_v30 = vsel %vm4506_vm13, %v1350_v7, 0.0  ;;  %vm4557_vm13 = vmand %vm1376_vm14, %vm1386_vm15  ;;  %vm4958_vm14 = vcmask 523264  }
 0x1ef   : > { %1482 = vst.msk [vmem:[#allocation2 + $0x99] sm:$0xff] %vm928_vm3, %v1431_v30  ;;  %vm4957_vm11 = vmmov %vm4956_vm2 }
 0x1f0   : > { %3353 = vrot.lane.b32.xlu1 %v3352_v37, %s3567_s16  ;;  %vm4959_vm15 = vmmov %vm4958_vm14 }
 0x1f1   : > { %3368 = vrot.lane.b32.xlu0 %v3352_v37, %s3570_s28 }
 0x1f3   : > { %v4529_v38 = vld [vmem:[#allocation2 + $0xa8] sm:$0xff] }
 0x1f4   : > { %3373 = vrot.lane.b32.xlu1 %v3347_v2, %s3565_s8  ;;  %v1613_v34 = vld [vmem:[#allocation2 + $0xa9] sm:$0xff]  ;;  %v1564_v54 = vld [vmem:[#allocation2 + $0x91] sm:$0xff] }
 0x1f5   : > { %3378 = vrot.lane.b32.xlu0 %v3352_v37, %s3564_s7  ;;  %v4531_v63 = vld [vmem:[#allocation2 + $0xb0] sm:$0xff] }
 0x1f6   : > { %v1629_v45 = vld [vmem:[#allocation2 + $0xaa] sm:$0xff]  ;;  %v1630_v62 = vld [vmem:[#allocation2 + $0xb2] sm:$0xff]  ;;  %v3382_v9 = vpack.i.bf16 %v4531_v63, %v4529_v38  ;;  %v1581_v4 = vld [vmem:[#allocation2 + $0x9a] sm:$0xff] }
 0x1f7   : > { %v3392_v55 = vpack.i.bf16 %v1630_v62, %v1629_v45  ;;  %v1614_v16 = vld [vmem:[#allocation2 + $0xb1] sm:$0xff]  ;;  %v1565_v32 = vld [vmem:[#allocation2 + $0x99] sm:$0xff] }
 0x1f8   : > { %3383 = vrot.lane.b32.xlu1 %v3382_v9, %s3568_s26  ;;  %v3387_v29 = vpack.i.bf16 %v1614_v16, %v1613_v34  ;;  %v4544_v58 = vld [vmem:[#allocation2 + $0x98] sm:$0xff]  ;;  %v4554_v60 = vld [vmem:[#allocation2 + $0x90] sm:$0xff]  ;;  %v3427_v39 = vpack.i.bf16 %v1565_v32, %v1564_v54  ;;  %v1490_v32 = vld [vmem:[#allocation2 + $0x8] sm:$0xff] }
 0x1f9   : > { %3393 = vrot.lane.b32.xlu0 %v3392_v55, %s3570_s28  ;;  %v3422_v48 = vpack.i.bf16 %v4544_v58, %v4554_v60  ;;  %v1580_v26 = vld [vmem:[#allocation2 + $0x92] sm:$0xff] }
 0x1fa   : > { %v3432_v2 = vpack.i.bf16 %v1581_v4, %v1580_v26 }
 0x1fc   : > { %3388 = vrot.lane.b32.xlu1 %v3387_v29, %s3569_s27 }
 0x1fd   : > { %3408 = vrot.lane.b32.xlu0 %v3382_v9, %s3563_s6 }
 0x200   : > { %3398 = vrot.lane.b32.xlu1 %v3387_v29, %s3565_s8 }
 0x201   : > { %3413 = vrot.lane.b32.xlu0 %v3387_v29, %s3566_s13 }
 0x202   : > { %v2707_v57 = vpop.f32.mrb[16].mxu0 }
 0x203   : > { %v1291_v27 = vadd.f32 %v2707_v57, %v4332_v3  ;;  %v1282_v47 = vpop.f32.mrb[17].mxu0 }
 0x204   : > { %v1283_v18 = vadd.f32 %v4332_v3, %v1282_v47  ;;  %v2708_v8 = vpop.f32.mrb[18].mxu0  ;;  %3403 = vrot.lane.b32.xlu1 %v3392_v55, %s3564_s7 }
 0x205   : > { %3418 = vrot.lane.b32.xlu0 %v3392_v55, %s3567_s16  ;;  %vm1315_vm0 = vcmp.gt.f32.partialorder %v1291_v27, 0.0  ;;  %v1335_v25 = vmul.f32 0.1, %v1291_v27  ;;  %v1294_v31 = vadd.f32 %v2708_v8, %v4332_v3  ;;  %v1285_v59 = vpop.f32.mrb[19].mxu0 }
 0x206   : > { %vm1313_vm12 = vcmp.gt.f32.partialorder %v1283_v18, 0.0  ;;  %v1333_v23 = vmul.f32 0.1, %v1283_v18  ;;  %v1286_v35 = vadd.f32 %v4332_v3, %v1285_v59 }
 0x207   : > { %v1355_v44 = vsel %vm1315_vm0, %v1291_v27, %v1335_v25  ;;  %vm1316_vm9 = vcmp.gt.f32.partialorder %v1294_v31, 0.0  ;;  %v1336_v53 = vmul.f32 0.1, %v1294_v31  ;;  %vm4960_vm0 = vcmask 588800  }
 0x208   : > { %v1436_v42 = vsel %vm4549_vm1, %v1355_v44, 0.0  ;;  %v1353_v36 = vsel %vm1313_vm12, %v1283_v18, %v1333_v23  ;;  %vm1314_vm10 = vcmp.gt.f32.partialorder %v1286_v35, 0.0  ;;  %v1334_v6 = vmul.f32 0.1, %v1286_v35  ;;  %3423 = vrot.lane.b32.xlu1 %v3422_v48, %s3563_s6 }
 0x209   : > { %3438 = vrot.lane.b32.xlu0 %v3422_v48, %s3568_s26  ;;  %1487 = vst.msk [vmem:[#allocation2 + $0xd9] sm:$0xff] %vm928_vm3, %v1436_v42  ;;  %v1434_v3 = vsel %vm4557_vm13, %v1353_v36, 0.0  ;;  %v1356_v5 = vsel %vm1316_vm9, %v1294_v31, %v1336_v53  ;;  %v1489_v53 = vld [vmem:[#allocation2] sm:$0xff] }
 0x20a   : > { %1485 = vst.msk [vmem:[#allocation2 + $0xc1] sm:$0xff] %vm928_vm3, %v1434_v3  ;;  %v1437_v1 = vsel %vm4549_vm1, %v1356_v5, 0.0  ;;  %v1354_v0 = vsel %vm1314_vm10, %v1286_v35, %v1334_v6  ;;  %v4580_v13 = vpop.permute.xlu0 %3198  ;;  %vm4961_vm1 = vmmov %vm4956_vm2 }
 0x20b   : > { %1488 = vst.msk [vmem:[#allocation2 + $0xe1] sm:$0xff] %vm928_vm3, %v1437_v1  ;;  %v1435_v43 = vsel %vm4557_vm13, %v1354_v0, 0.0  ;;  %v3189_v29 = vpop.permute.xlu1 %3188  ;;  %v3200_v54 = vunpack.i.l.bf16 %v4580_v13  ;;  %v3201_v0 = vunpack.i.h.bf16 %v4580_v13  ;;  %vm4962_vm12 = vmmov %vm4961_vm1 }
 0x20c   : > { %1486 = vst.msk [vmem:[#allocation2 + $0xc9] sm:$0xff] %vm928_vm3, %v1435_v43  ;;  %3428 = vrot.lane.b32.xlu1 %v3427_v39, %s3566_s13  ;;  %v3190_v43 = vunpack.i.l.bf16 %v3189_v29  ;;  %vm4963_vm13 = vmmov %vm4958_vm14 }
 0x20d   : > { %3443 = vrot.lane.b32.xlu0 %v3427_v39, %s3569_s27  ;;  %vm4964_vm9 = vmmov %vm4963_vm13 }
 0x20e   : > { %v4584_v17 = vpop.permute.xlu0 %3203  ;;  %vm4965_vm10 = vmmov %vm4960_vm0 }
 0x20f   : > { %v3194_v50 = vpop.permute.xlu1 %3193  ;;  %v3205_v4 = vunpack.i.l.bf16 %v4584_v17 }
 0x210   : > { %3433 = vrot.lane.b32.xlu1 %v3432_v2, %s3567_s16  ;;  %v1601_v46 = vld [vmem:[#allocation2 + $0xd8] sm:$0xff] }
 0x211   : > { %3448 = vrot.lane.b32.xlu0 %v3432_v2, %s3570_s28  ;;  %v1599_v12 = vld [vmem:[#allocation2 + $0xc0] sm:$0xff] }
 0x212   : > { %v1602_v14 = vld [vmem:[#allocation2 + $0xe0] sm:$0xff]  ;;  %v4590_v45 = vpop.permute.xlu0 %3208 }
 0x213   : > { %v1600_v33 = vld [vmem:[#allocation2 + $0xc8] sm:$0xff]  ;;  %v3462_v15 = vpack.i.bf16 %v1602_v14, %v1601_v46  ;;  %v1617_v30 = vld [vmem:[#allocation2 + $0xd9] sm:$0xff]  ;;  %v3206_v46 = vunpack.i.h.bf16 %v4584_v17 }
 0x214   : > { %3453 = vrot.lane.b32.xlu1 %v3427_v39, %s3565_s8  ;;  %v3487_v10 = vpack.i.bf16 %v1600_v33, %v1599_v12  ;;  %v1618_v40 = vld [vmem:[#allocation2 + $0xe1] sm:$0xff]  ;;  %v1616_v7 = vld [vmem:[#allocation2 + $0xc9] sm:$0xff]  ;;  %v3191_v39 = vunpack.i.h.bf16 %v3189_v29  ;;  %v3196_v12 = vunpack.i.h.bf16 %v3194_v50 }
 0x215   : > { %3458 = vrot.lane.b32.xlu0 %v3432_v2, %s3564_s7  ;;  %v1615_v37 = vld [vmem:[#allocation2 + $0xc1] sm:$0xff]  ;;  %v3467_v62 = vpack.i.bf16 %v1618_v40, %v1617_v30  ;;  %v1632_v16 = vld [vmem:[#allocation2 + $0xca] sm:$0xff]  ;;  %v2149_v40 = vsel %vm928_vm3, %v4360_v49, %v3190_v43  ;;  %s2614_s7 = sshll.u32 %s5000_s19, 5 }
 0x216   : > { %v3492_v9 = vpack.i.bf16 %v1616_v7, %v1615_v37  ;;  %v1631_v55 = vld [vmem:[#allocation2 + $0xc2] sm:$0xff]  ;;  %v3214_v11 = vpop.permute.xlu0 %3213  ;;  %v1633_v27 = vld [vmem:[#allocation2 + $0xda] sm:$0xff]  ;;  %v2150_v13 = vsel %vm928_vm3, %v4362_v56, %v3191_v39  ;;  %v3210_v7 = vunpack.i.l.bf16 %v4590_v45 }
 0x217   : > { %v3497_v34 = vpack.i.bf16 %v1632_v16, %v1631_v55  ;;  %v1634_v47 = vld [vmem:[#allocation2 + $0xe2] sm:$0xff]  ;;  %v3215_v59 = vunpack.i.l.bf16 %v3214_v11  ;;  %v3216_v23 = vunpack.i.h.bf16 %v3214_v11  ;;  %v2166_v29 = vsel %vm949_vm4, %v2150_v13, %v3196_v12 }
 0x218   : > { %3463 = vrot.lane.b32.xlu1 %v3462_v15, %s3568_s26  ;;  %v3502_v25 = vpack.i.bf16 %v1634_v47, %v1633_v27  ;;  %v3195_v15 = vunpack.i.l.bf16 %v3194_v50  ;;  %v3211_v11 = vunpack.i.h.bf16 %v4590_v45 }
 0x219   : > { %3488 = vrot.lane.b32.xlu0 %v3487_v10, %s3568_s26  ;;  %v2147_v42 = vsel %vm928_vm3, %v1489_v53, %v3215_v59  ;;  %v2148_v36 = vsel %vm928_vm3, %v1490_v32, %v3216_v23 }
 0x21a   : > { %v3219_v57 = vpop.permute.xlu0 %3218 }
 0x21b   : > { %v3220_v24 = vunpack.i.l.bf16 %v3219_v57  ;;  %v3221_v44 = vunpack.i.h.bf16 %v3219_v57 }
 0x21c   : > { %3468 = vrot.lane.b32.xlu1 %v3467_v62, %s3569_s27 }
 0x21d   : > { %3493 = vrot.lane.b32.xlu0 %v3492_v9, %s3569_s27  ;;  %v2163_v6 = vsel %vm949_vm4, %v2147_v42, %v3220_v24  ;;  %v2164_v1 = vsel %vm949_vm4, %v2148_v36, %v3221_v44 }
 0x21e   : > { %v2179_v26 = vsel %vm970_vm5, %v2163_v6, %v3200_v54  ;;  %v2180_v2 = vsel %vm970_vm5, %v2164_v1, %v3201_v0 }
 0x21f   : > { %v2196_v30 = vsel %vm991_vm6, %v2180_v2, %v3206_v46 }
 0x220   : > { %3473 = vrot.lane.b32.xlu1 %v3487_v10, %s3563_s6  ;;  %v2195_v10 = vsel %vm991_vm6, %v2179_v26, %v3205_v4  ;;  %v2212_v23 = vsel %vm1012_vm7, %v2196_v30, %v3211_v11  ;;  %s2613_s6 = sshll.u32 %s5002_s30, 1 }
 0x221   : > { %3498 = vrot.lane.b32.xlu0 %v3497_v34, %s3570_s28  ;;  %v2211_v49 = vsel %vm1012_vm7, %v2195_v10, %v3210_v7  ;;  %s246_s8 = sadd.s32 %s2614_s7, %s2613_s6 }
 0x222   : > { %s2615_s26 = sshll.u32 %s246_s8, 3 }
 0x223   : > { %s4864_s18 = scalar_lea.vmem %s4932_s5, %s2615_s26 }
 0x224   : > { %3478 = vrot.lane.b32.xlu1 %v3492_v9, %s3566_s13 }
 0x228   : > { %3483 = vrot.lane.b32.xlu1 %v3497_v34, %s3567_s16  ;;  %v2165_v34 = vsel %vm949_vm4, %v2149_v40, %v3195_v15 }
 0x22a   : > { %v4598_v18 = vpop.permute.xlu1 %3223 }
 0x22b   : > { %v4600_v8 = vpop.permute.xlu0 %3233  ;;  %v3226_v47 = vunpack.i.h.bf16 %v4598_v18 }
 0x22c   : > { %3503 = vrot.lane.b32.xlu1 %v3502_v25, %s3570_s28  ;;  %v3225_v25 = vunpack.i.l.bf16 %v4598_v18  ;;  %v3236_v13 = vunpack.i.h.bf16 %v4600_v8  ;;  %v3235_v7 = vunpack.i.l.bf16 %v4600_v8 }
 0x22e   : > { %v4603_v51 = vpop.permute.xlu1 %3228 }
 0x22f   : > { %v4605_v31 = vpop.permute.xlu0 %3248  ;;  %v3231_v59 = vunpack.i.h.bf16 %v4603_v51 }
 0x232   : > { %v4607_v35 = vpop.permute.xlu1 %3238 }
 0x233   : > { %v4609_v48 = vpop.permute.xlu0 %3253 }
 0x236   : > { %v4614_v3 = vpop.permute.xlu1 %3243 }
 0x237   : > { %v4616_v5 = vpop.permute.xlu0 %3258 }
 0x23a   : > { %v3264_v14 = vpop.permute.xlu1 %3263 }
 0x23b   : > { %v3279_v33 = vpop.permute.xlu0 %3278  ;;  %v3266_v37 = vunpack.i.h.bf16 %v3264_v14  ;;  %v3265_v62 = vunpack.i.l.bf16 %v3264_v14 }
 0x23c   : > { %v3281_v9 = vunpack.i.h.bf16 %v3279_v33  ;;  %v3280_v55 = vunpack.i.l.bf16 %v3279_v33  ;;  %v3230_v33 = vunpack.i.l.bf16 %v4603_v51 }
 0x23d   : > { %v2182_v24 = vsel %vm970_vm5, %v2166_v29, %v3266_v37  ;;  %v2181_v44 = vsel %vm970_vm5, %v2165_v34, %v3265_v62 }
 0x23e   : > { %v3269_v16 = vpop.permute.xlu1 %3268  ;;  %v2227_v45 = vsel %vm1033_vm8, %v2211_v49, %v3280_v55  ;;  %v2228_v53 = vsel %vm1033_vm8, %v2212_v23, %v3281_v9 }
 0x23f   : > { %v3284_v17 = vpop.permute.xlu0 %3283  ;;  %v3271_v50 = vunpack.i.h.bf16 %v3269_v16  ;;  %v3270_v56 = vunpack.i.l.bf16 %v3269_v16 }
 0x240   : > { %v3286_v57 = vunpack.i.h.bf16 %v3284_v17  ;;  %v3285_v27 = vunpack.i.l.bf16 %v3284_v17 }
 0x241   : > { %v2197_v18 = vsel %vm991_vm6, %v2181_v44, %v3270_v56  ;;  %v2198_v0 = vsel %vm991_vm6, %v2182_v24, %v3271_v50  ;;  %v3251_v24 = vunpack.i.h.bf16 %v4605_v31  ;;  %v3250_v44 = vunpack.i.l.bf16 %v4605_v31 }
 0x242   : > { %v3274_v32 = vpop.permute.xlu1 %3273  ;;  %v2243_v39 = vsel %vm4956_vm2, %v2227_v45, %v3285_v27  ;;  %v2244_v43 = vsel %vm4957_vm11, %v2228_v53, %v3286_v57  ;;  %v3240_v45 = vunpack.i.l.bf16 %v4607_v35  ;;  %v3241_v53 = vunpack.i.h.bf16 %v4607_v35  ;;  %vm4966_vm2 = vmmov %vm4961_vm1 }
 0x243   : > { %v3289_v42 = vpop.permute.xlu0 %3288  ;;  %v3276_v36 = vunpack.i.h.bf16 %v3274_v32  ;;  %v3275_v6 = vunpack.i.l.bf16 %v3274_v32  ;;  %vm4967_vm11 = vmmov %vm4961_vm1 }
 0x244   : > { %v3291_v54 = vunpack.i.h.bf16 %v3289_v42  ;;  %v3290_v1 = vunpack.i.l.bf16 %v3289_v42  ;;  %v2153_v31 = vsel %vm928_vm3, %v4399_v19, %v3240_v45  ;;  %v2154_v35 = vsel %vm928_vm3, %v4401_v22, %v3241_v53 }
 0x245   : > { %v2213_v26 = vsel %vm1012_vm7, %v2197_v18, %v3275_v6  ;;  %v2214_v4 = vsel %vm1012_vm7, %v2198_v0, %v3276_v36  ;;  %v3256_v36 = vunpack.i.h.bf16 %v4609_v48  ;;  %v3255_v6 = vunpack.i.l.bf16 %v4609_v48 }
 0x246   : > { %v2259_v2 = vsel %vm4958_vm14, %v2243_v39, %v3290_v1  ;;  %v2260_v14 = vsel %vm4959_vm15, %v2244_v43, %v3291_v54  ;;  %v2229_v46 = vsel %vm1033_vm8, %v2213_v26, %v3225_v25  ;;  %v2230_v12 = vsel %vm1033_vm8, %v2214_v4, %v3226_v47  ;;  %v3294_v15 = vpop.permute.xlu1 %3293  ;;  %vm4968_vm14 = vmmov %vm4964_vm9 }
 0x247   : > { %v3299_v10 = vpop.permute.xlu0 %3298  ;;  %v2275_v40 = vpack.c.bf16 %v2260_v14, %v2259_v2  ;;  %v2245_v30 = vsel %vm4961_vm1, %v2229_v46, %v3230_v33  ;;  %v2246_v37 = vsel %vm4962_vm12, %v2230_v12, %v3231_v59  ;;  %v3296_v34 = vunpack.i.h.bf16 %v3294_v15  ;;  %vm4969_vm15 = vmmov %vm4964_vm9 }
 0x248   : > { %v2261_v62 = vsel %vm4963_vm13, %v2245_v30, %v3235_v7  ;;  %v2262_v51 = vsel %vm4964_vm9, %v2246_v37, %v3236_v13  ;;  %v3295_v29 = vunpack.i.l.bf16 %v3294_v15  ;;  %v3301_v50 = vunpack.i.h.bf16 %v3299_v10  ;;  %vm4970_vm12 = vmmov %vm4961_vm1 }
 0x249   : > { %2719 = vmatprep.mubr.msk.bf16.mxu1 %vm4960_vm0, %v2275_v40  ;;  %v2276_v16 = vpack.c.bf16 %v2262_v51, %v2261_v62  ;;  %v3300_v56 = vunpack.i.l.bf16 %v3299_v10  ;;  %v2152_v27 = vsel %vm928_vm3, %v4422_v28, %v3296_v34  ;;  %v3246_v54 = vunpack.i.h.bf16 %v4614_v3  ;;  %vm4971_vm13 = vmmov %vm4964_vm9 }
 0x24a   : > { %v4662_v9 = vpop.permute.xlu1 %3303  ;;  %v2151_v57 = vsel %vm928_vm3, %v4429_v52, %v3295_v29  ;;  %v2168_v59 = vsel %vm949_vm4, %v2152_v27, %v3301_v50  ;;  %v3245_v1 = vunpack.i.l.bf16 %v4614_v3  ;;  %v3261_v18 = vunpack.i.h.bf16 %v4616_v5 }
 0x24b   : > { %v4664_v55 = vpop.permute.xlu0 %3313  ;;  %2720 = vmatmul.mubr.msk.bf16.vlgmr.msra.gmra.mrb[0].mxu1 %vm4965_vm10, %v2276_v16  ;;  %v2167_v23 = vsel %vm949_vm4, %v2151_v57, %v3300_v56  ;;  %v2184_v28 = vsel %vm970_vm5, %v2168_v59, %v3251_v24  ;;  %v2170_v33 = vsel %vm949_vm4, %v2154_v35, %v3246_v54  ;;  %v3260_v19 = vunpack.i.l.bf16 %v4616_v5  ;;  %vm4972_vm10 = vmmov %vm4960_vm0 }
 0x24c   : > { %v2183_v52 = vsel %vm970_vm5, %v2167_v23, %v3250_v44  ;;  %v2200_v39 = vsel %vm991_vm6, %v2184_v28, %v3256_v36  ;;  %v2169_v3 = vsel %vm949_vm4, %v2153_v31, %v3245_v1  ;;  %v3306_v22 = vunpack.i.h.bf16 %v4662_v9 }
 0x24d   : > { %v2199_v0 = vsel %vm991_vm6, %v2183_v52, %v3255_v6  ;;  %v3305_v40 = vunpack.i.l.bf16 %v4662_v9  ;;  %v2216_v30 = vsel %vm1012_vm7, %v2200_v39, %v3261_v18  ;;  %v3316_v54 = vunpack.i.h.bf16 %v4664_v55 }
 0x24e   : > { %v4667_v17 = vpop.permute.xlu1 %3308  ;;  %v2215_v7 = vsel %vm1012_vm7, %v2199_v0, %v3260_v19  ;;  %v3315_v1 = vunpack.i.l.bf16 %v4664_v55 }
 0x24f   : > { %v4669_v8 = vpop.permute.xlu0 %3328  ;;  %v3311_v13 = vunpack.i.h.bf16 %v4667_v17  ;;  %v3310_v52 = vunpack.i.l.bf16 %v4667_v17 }
 0x252   : > { %v4671_v11 = vpop.permute.xlu1 %3318 }
 0x253   : > { %v4673_v49 = vpop.permute.xlu0 %3333 }
 0x256   : > { %v4679_v47 = vpop.permute.xlu1 %3323 }
 0x257   : > { %v4681_v25 = vpop.permute.xlu0 %3338 }
 0x25a   : > { %v3344_v32 = vpop.permute.xlu1 %3343 }
 0x25b   : > { %v3359_v42 = vpop.permute.xlu0 %3358  ;;  %v3346_v43 = vunpack.i.h.bf16 %v3344_v32  ;;  %v3345_v26 = vunpack.i.l.bf16 %v3344_v32 }
 0x25c   : > { %v3361_v4 = vunpack.i.h.bf16 %v3359_v42  ;;  %v3360_v48 = vunpack.i.l.bf16 %v3359_v42 }
 0x25d   : > { %v2186_v37 = vsel %vm970_vm5, %v2170_v33, %v3346_v43  ;;  %v2185_v62 = vsel %vm970_vm5, %v2169_v3, %v3345_v26 }
 0x25e   : > { %v3349_v2 = vpop.permute.xlu1 %3348  ;;  %v2231_v5 = vsel %vm1033_vm8, %v2215_v7, %v3360_v48  ;;  %v2232_v51 = vsel %vm1033_vm8, %v2216_v30, %v3361_v4  ;;  %v3321_v7 = vunpack.i.h.bf16 %v4671_v11  ;;  %v3320_v30 = vunpack.i.l.bf16 %v4671_v11 }
 0x25f   : > { %v3364_v14 = vpop.permute.xlu0 %3363  ;;  %v3351_v46 = vunpack.i.h.bf16 %v3349_v2  ;;  %v3350_v12 = vunpack.i.l.bf16 %v3349_v2 }
 0x260   : > { %v3366_v15 = vunpack.i.h.bf16 %v3364_v14  ;;  %v3365_v10 = vunpack.i.l.bf16 %v3364_v14  ;;  %v2157_v11 = vsel %vm928_vm3, %v4474_v21, %v3320_v30 }
 0x261   : > { %v2201_v57 = vsel %vm991_vm6, %v2185_v62, %v3350_v12  ;;  %v2202_v27 = vsel %vm991_vm6, %v2186_v37, %v3351_v46 }
 0x262   : > { %v3354_v16 = vpop.permute.xlu1 %3353  ;;  %v2247_v59 = vsel %vm4966_vm2, %v2231_v5, %v3365_v10  ;;  %v2248_v23 = vsel %vm4967_vm11, %v2232_v51, %v3366_v15  ;;  %v3336_v51 = vunpack.i.h.bf16 %v4673_v49  ;;  %vm4973_vm2 = vmmov %vm4961_vm1 }
 0x263   : > { %v3369_v34 = vpop.permute.xlu0 %3368  ;;  %v3356_v29 = vunpack.i.h.bf16 %v3354_v16  ;;  %v3355_v50 = vunpack.i.l.bf16 %v3354_v16  ;;  %v3335_v16 = vunpack.i.l.bf16 %v4673_v49  ;;  %vm4974_vm11 = vmmov %vm4961_vm1 }
 0x264   : > { %v3371_v56 = vunpack.i.h.bf16 %v3369_v34  ;;  %v3370_v9 = vunpack.i.l.bf16 %v3369_v34  ;;  %v3326_v34 = vunpack.i.h.bf16 %v4679_v47 }
 0x265   : > { %v2217_v24 = vsel %vm1012_vm7, %v2201_v57, %v3355_v50  ;;  %v2218_v44 = vsel %vm1012_vm7, %v2202_v27, %v3356_v29  ;;  %v3341_v29 = vunpack.i.h.bf16 %v4681_v25 }
 0x266   : > { %v2263_v45 = vsel %vm4968_vm14, %v2247_v59, %v3370_v9  ;;  %v2264_v53 = vsel %vm4969_vm15, %v2248_v23, %v3371_v56  ;;  %v2233_v28 = vsel %vm1033_vm8, %v2217_v24, %v3305_v40  ;;  %v2234_v32 = vsel %vm1033_vm8, %v2218_v44, %v3306_v22  ;;  %v3374_v36 = vpop.permute.xlu1 %3373  ;;  %vm4975_vm14 = vmmov %vm4964_vm9 }
 0x267   : > { %v2277_v42 = vpack.c.bf16 %v2264_v53, %v2263_v45  ;;  %v3379_v6 = vpop.permute.xlu0 %3378  ;;  %v2249_v31 = vsel %vm4961_vm1, %v2233_v28, %v3310_v52  ;;  %v2250_v35 = vsel %vm4970_vm12, %v2234_v32, %v3311_v13  ;;  %v3376_v4 = vunpack.i.h.bf16 %v3374_v36  ;;  %vm4976_vm15 = vmmov %vm4964_vm9 }
 0x268   : > { %v2265_v18 = vsel %vm4971_vm13, %v2249_v31, %v3315_v1  ;;  %v2266_v17 = vsel %vm4964_vm9, %v2250_v35, %v3316_v54  ;;  %v3375_v48 = vunpack.i.l.bf16 %v3374_v36  ;;  %v3381_v3 = vunpack.i.h.bf16 %v3379_v6  ;;  %vm4977_vm12 = vmmov %vm4961_vm1 }
 0x269   : > { %2723 = vmatprep.mubr.msk.bf16.mxu1 %vm4960_vm0, %v2277_v42  ;;  %v2278_v43 = vpack.c.bf16 %v2266_v17, %v2265_v18  ;;  %v3380_v33 = vunpack.i.l.bf16 %v3379_v6  ;;  %v2156_v19 = vsel %vm928_vm3, %v4488_v61, %v3376_v4  ;;  %v3331_v40 = vunpack.i.h.bf16 %v4669_v8  ;;  %vm4978_vm13 = vmmov %vm4964_vm9 }
 0x26a   : > { %v4732_v0 = vpop.permute.xlu1 %3383  ;;  %v2155_v22 = vsel %vm928_vm3, %v4492_v41, %v3375_v48  ;;  %v2172_v15 = vsel %vm949_vm4, %v2156_v19, %v3381_v3  ;;  %v3330_v13 = vunpack.i.l.bf16 %v4669_v8  ;;  %v3325_v61 = vunpack.i.l.bf16 %v4679_v47 }
 0x26b   : > { %v4734_v39 = vpop.permute.xlu0 %3393  ;;  %2724 = vmatmul.mubr.msk.bf16.gmra.mrb[4].mxu1 %vm4972_vm10, %v2278_v43  ;;  %v2171_v10 = vsel %vm949_vm4, %v2155_v22, %v3380_v33  ;;  %v2188_v37 = vsel %vm970_vm5, %v2172_v15, %v3331_v40  ;;  %v2158_v8 = vsel %vm928_vm3, %v4476_v20, %v3321_v7  ;;  %v3340_v56 = vunpack.i.l.bf16 %v4681_v25  ;;  %vm4979_vm10 = vmmov %vm4960_vm0 }
 0x26c   : > { %v2187_v41 = vsel %vm970_vm5, %v2171_v10, %v3330_v13  ;;  %v2173_v50 = vsel %vm949_vm4, %v2157_v11, %v3325_v61  ;;  %v2204_v57 = vsel %vm991_vm6, %v2188_v37, %v3336_v51  ;;  %v2174_v20 = vsel %vm949_vm4, %v2158_v8, %v3326_v34 }
 0x26d   : > { %v2203_v9 = vsel %vm991_vm6, %v2187_v41, %v3335_v16  ;;  %v3386_v21 = vunpack.i.h.bf16 %v4732_v0  ;;  %v3385_v44 = vunpack.i.l.bf16 %v4732_v0  ;;  %v3396_v45 = vunpack.i.h.bf16 %v4734_v39 }
 0x26e   : > { %v4737_v26 = vpop.permute.xlu1 %3388  ;;  %v3395_v32 = vunpack.i.l.bf16 %v4734_v39  ;;  %v2219_v36 = vsel %vm1012_vm7, %v2203_v9, %v3340_v56  ;;  %v2220_v6 = vsel %vm1012_vm7, %v2204_v57, %v3341_v29 }
 0x26f   : > { %v4739_v55 = vpop.permute.xlu0 %3408  ;;  %v3391_v42 = vunpack.i.h.bf16 %v4737_v26  ;;  %v3390_v13 = vunpack.i.l.bf16 %v4737_v26 }
 0x270   : > { %v3411_v34 = vunpack.i.h.bf16 %v4739_v55  ;;  %v3410_v8 = vunpack.i.l.bf16 %v4739_v55 }
 0x272   : > { %v4741_v2 = vpop.permute.xlu1 %3398 }
 0x273   : > { %v4743_v14 = vpop.permute.xlu0 %3413 }
 0x276   : > { %v4749_v46 = vpop.permute.xlu1 %3403 }
 0x277   : > { %v4751_v12 = vpop.permute.xlu0 %3418 }
 0x27a   : > { %v3424_v62 = vpop.permute.xlu1 %3423 }
 0x27b   : > { %v3439_v5 = vpop.permute.xlu0 %3438  ;;  %v3426_v27 = vunpack.i.h.bf16 %v3424_v62  ;;  %v3425_v49 = vunpack.i.l.bf16 %v3424_v62 }
 0x27c   : > { %v3441_v59 = vunpack.i.h.bf16 %v3439_v5  ;;  %v3440_v47 = vunpack.i.l.bf16 %v3439_v5 }
 0x27d   : > { %v2189_v54 = vsel %vm970_vm5, %v2173_v50, %v3425_v49  ;;  %v2190_v1 = vsel %vm970_vm5, %v2174_v20, %v3426_v27 }
 0x27e   : > { %v3429_v23 = vpop.permute.xlu1 %3428  ;;  %v2235_v31 = vsel %vm1033_vm8, %v2219_v36, %v3440_v47  ;;  %v2236_v35 = vsel %vm1033_vm8, %v2220_v6, %v3441_v59  ;;  %v3416_v47 = vunpack.i.h.bf16 %v4743_v14 }
 0x27f   : > { %v3444_v24 = vpop.permute.xlu0 %3443  ;;  %v3431_v53 = vunpack.i.h.bf16 %v3429_v23  ;;  %v3430_v25 = vunpack.i.l.bf16 %v3429_v23  ;;  %v3415_v23 = vunpack.i.l.bf16 %v4743_v14 }
 0x280   : > { %v3446_v52 = vunpack.i.h.bf16 %v3444_v24  ;;  %v3445_v28 = vunpack.i.l.bf16 %v3444_v24 }
 0x281   : > { %v2205_v48 = vsel %vm991_vm6, %v2189_v54, %v3430_v25  ;;  %v2206_v3 = vsel %vm991_vm6, %v2190_v1, %v3431_v53 }
 0x282   : > { %v3434_v18 = vpop.permute.xlu1 %3433  ;;  %v2251_v33 = vsel %vm4973_vm2, %v2235_v31, %v3445_v28  ;;  %v2252_v19 = vsel %vm4974_vm11, %v2236_v35, %v3446_v52  ;;  %vm4980_vm2 = vmmov %vm4961_vm1 }
 0x283   : > { %v3449_v17 = vpop.permute.xlu0 %3448  ;;  %v3436_v0 = vunpack.i.h.bf16 %v3434_v18  ;;  %v3435_v43 = vunpack.i.l.bf16 %v3434_v18  ;;  %vm4981_vm11 = vmmov %vm4961_vm1 }
 0x284   : > { %v3451_v4 = vunpack.i.h.bf16 %v3449_v17  ;;  %v3450_v39 = vunpack.i.l.bf16 %v3449_v17  ;;  %v3401_v17 = vunpack.i.h.bf16 %v4741_v2 }
 0x285   : > { %v2221_v22 = vsel %vm1012_vm7, %v2205_v48, %v3435_v43  ;;  %v2222_v15 = vsel %vm1012_vm7, %v2206_v3, %v3436_v0  ;;  %v3400_v0 = vunpack.i.l.bf16 %v4741_v2  ;;  %v3405_v48 = vunpack.i.l.bf16 %v4749_v46 }
 0x286   : > { %v2267_v10 = vsel %vm4975_vm14, %v2251_v33, %v3450_v39  ;;  %v2268_v40 = vsel %vm4976_vm15, %v2252_v19, %v3451_v4  ;;  %v2237_v7 = vsel %vm1033_vm8, %v2221_v22, %v3385_v44  ;;  %v2238_v30 = vsel %vm1033_vm8, %v2222_v15, %v3386_v21  ;;  %v3454_v41 = vpop.permute.xlu1 %3453  ;;  %vm4982_vm14 = vmmov %vm4964_vm9 }
 0x287   : > { %v2279_v61 = vpack.c.bf16 %v2268_v40, %v2267_v10  ;;  %v3459_v37 = vpop.permute.xlu0 %3458  ;;  %v3456_v62 = vunpack.i.h.bf16 %v3454_v41  ;;  %v3455_v5 = vunpack.i.l.bf16 %v3454_v41  ;;  %v2253_v11 = vsel %vm4961_vm1, %v2237_v7, %v3390_v13  ;;  %vm4983_vm15 = vmmov %vm4964_vm9 }
 0x288   : > { %v3461_v51 = vunpack.i.h.bf16 %v3459_v37  ;;  %v3460_v16 = vunpack.i.l.bf16 %v3459_v37  ;;  %v2254_v26 = vsel %vm4977_vm12, %v2238_v30, %v3391_v42  ;;  %v2269_v56 = vsel %vm4978_vm13, %v2253_v11, %v3395_v32  ;;  %vm4988_vm12 = vmmov %vm4960_vm0 }
 0x289   : > { %2727 = vmatprep.mubr.msk.bf16.mxu1 %vm4960_vm0, %v2279_v61  ;;  %v2160_v29 = vsel %vm928_vm3, %v4544_v58, %v3456_v62  ;;  %v2159_v50 = vsel %vm928_vm3, %v4554_v60, %v3455_v5  ;;  %v2270_v9 = vsel %vm4964_vm9, %v2254_v26, %v3396_v45  ;;  %v3421_v21 = vunpack.i.h.bf16 %v4751_v12 }
 0x28a   : > { %v2176_v57 = vsel %vm949_vm4, %v2160_v29, %v3461_v51  ;;  %v2175_v55 = vsel %vm949_vm4, %v2159_v50, %v3460_v16  ;;  %v3464_v27 = vpop.permute.xlu1 %3463  ;;  %v2280_v59 = vpack.c.bf16 %v2270_v9, %v2269_v56  ;;  %v3420_v44 = vunpack.i.l.bf16 %v4751_v12 }
 0x28b   : > { %v3489_v49 = vpop.permute.xlu0 %3488  ;;  %v2191_v58 = vsel %vm970_vm5, %v2175_v55, %v3410_v8  ;;  %v2192_v24 = vsel %vm970_vm5, %v2176_v57, %v3411_v34  ;;  %v3406_v39 = vunpack.i.h.bf16 %v4749_v46  ;;  %v2162_v40 = vsel %vm928_vm3, %v4531_v63, %v3401_v17 }
 0x28c   : > { %2728 = vmatmul.mubr.msk.bf16.gmra.mrb[8].mxu1 %vm4979_vm10, %v2280_v59  ;;  %v2207_v60 = vsel %vm991_vm6, %v2191_v58, %v3415_v23  ;;  %v2208_v20 = vsel %vm991_vm6, %v2192_v24, %v3416_v47  ;;  %v3491_v25 = vunpack.i.h.bf16 %v3489_v49  ;;  %v3490_v52 = vunpack.i.l.bf16 %v3489_v49  ;;  %v4857_v59 = vld [vmem:[%s4931_s4] ss:$0 sm:$0xff] }
 0x28d   : > { %v2223_v14 = vsel %vm1012_vm7, %v2207_v60, %v3420_v44  ;;  %v2224_v28 = vsel %vm1012_vm7, %v2208_v20, %v3421_v21  ;;  %v2161_v2 = vsel %vm928_vm3, %v4529_v38, %v3400_v0  ;;  %v2178_v7 = vsel %vm949_vm4, %v2162_v40, %v3406_v39 }
 0x28e   : > { %v3469_v45 = vpop.permute.xlu1 %3468  ;;  %v2239_v54 = vsel %vm1033_vm8, %v2223_v14, %v3490_v52  ;;  %v2240_v1 = vsel %vm1033_vm8, %v2224_v28, %v3491_v25  ;;  %v2177_v13 = vsel %vm949_vm4, %v2161_v2, %v3405_v48  ;;  %v3466_v62 = vunpack.i.h.bf16 %v3464_v27  ;;  %vm4984_vm4 = vmmov %vm4961_vm1 }
 0x28f   : > { %v3494_v53 = vpop.permute.xlu0 %3493  ;;  %v3465_v5 = vunpack.i.l.bf16 %v3464_v27  ;;  %v3471_v16 = vunpack.i.h.bf16 %v3469_v45  ;;  %v3470_v38 = vunpack.i.l.bf16 %v3469_v45 }
 0x290   : > { %v3496_v32 = vunpack.i.h.bf16 %v3494_v53  ;;  %v3495_v42 = vunpack.i.l.bf16 %v3494_v53 }
 0x292   : > { %v3474_v36 = vpop.permute.xlu1 %3473  ;;  %v2255_v12 = vsel %vm4980_vm2, %v2239_v54, %v3495_v42  ;;  %v2256_v18 = vsel %vm4981_vm11, %v2240_v1, %v3496_v32 }
 0x293   : > { %v3499_v6 = vpop.permute.xlu0 %3498  ;;  %v3476_v19 = vunpack.i.h.bf16 %v3474_v36  ;;  %v3475_v22 = vunpack.i.l.bf16 %v3474_v36 }
 0x294   : > { %v3501_v31 = vunpack.i.h.bf16 %v3499_v6  ;;  %v3500_v35 = vunpack.i.l.bf16 %v3499_v6 }
 0x295   : > { %v2193_v46 = vsel %vm970_vm5, %v2177_v13, %v3475_v22  ;;  %v2194_v61 = vsel %vm970_vm5, %v2178_v7, %v3476_v19  ;;  %vm4985_vm5 = vmmov %vm4961_vm1 }
 0x296   : > { %v2271_v43 = vsel %vm4982_vm14, %v2255_v12, %v3500_v35  ;;  %v2272_v4 = vsel %vm4983_vm15, %v2256_v18, %v3501_v31  ;;  %v3479_v33 = vpop.permute.xlu1 %3478 }
 0x297   : > { %v2281_v3 = vpack.c.bf16 %v2272_v4, %v2271_v43  ;;  %v3481_v15 = vunpack.i.h.bf16 %v3479_v33  ;;  %v3480_v10 = vunpack.i.l.bf16 %v3479_v33 }
 0x299   : > { %2731 = vmatprep.mubr.msk.bf16.mxu1 %vm4960_vm0, %v2281_v3  ;;  %v2209_v51 = vsel %vm991_vm6, %v2193_v46, %v3480_v10  ;;  %v2210_v63 = vsel %vm991_vm6, %v2194_v61, %v3481_v15  ;;  %vm4986_vm6 = vmmov %vm4964_vm9 }
 0x29a   : > { %v3484_v30 = vpop.permute.xlu1 %3483  ;;  %vm4987_vm1 = vmmov %vm4986_vm6 }
 0x29b   : > { %v3486_v41 = vunpack.i.h.bf16 %v3484_v30  ;;  %v3485_v37 = vunpack.i.l.bf16 %v3484_v30 }
 0x29d   : > { %v2225_v34 = vsel %vm1012_vm7, %v2209_v51, %v3485_v37  ;;  %v2226_v8 = vsel %vm1012_vm7, %v2210_v63, %v3486_v41 }
 0x29e   : > { %v2241_v11 = vsel %vm1033_vm8, %v2225_v34, %v3465_v5  ;;  %v2242_v26 = vsel %vm1033_vm8, %v2226_v8, %v3466_v62  ;;  %v3504_v29 = vpop.permute.xlu1 %3503 }
 0x29f   : > { %v3506_v50 = vunpack.i.h.bf16 %v3504_v29  ;;  %v3505_v56 = vunpack.i.l.bf16 %v3504_v29  ;;  %v2257_v9 = vsel %vm4984_vm4, %v2241_v11, %v3470_v38  ;;  %v2258_v57 = vsel %vm4985_vm5, %v2242_v26, %v3471_v16 }
 0x2a1   : > { %v2273_v55 = vsel %vm4986_vm6, %v2257_v9, %v3505_v56  ;;  %v2274_v27 = vsel %vm4987_vm1, %v2258_v57, %v3506_v50 }
 0x2a2   : > { %v2282_v49 = vpack.c.bf16 %v2274_v27, %v2273_v55 }
 0x2a4   : > { %2732 = vmatmul.mubr.msk.bf16.gmra.mrb[12].mxu1 %vm4988_vm12, %v2282_v49 }
 0x31e   : > { %v2721_v47 = vpop.f32.mrb[0].mxu1 }
 0x31f   : > { %v2396_v23 = vadd.f32 %v2721_v47, %v4857_v59  ;;  %v2387_v58 = vpop.f32.mrb[1].mxu1 }
 0x320   : > { %v2388_v24 = vadd.f32 %v4857_v59, %v2387_v58  ;;  %v2722_v60 = vpop.f32.mrb[2].mxu1 }
 0x321   : > { %vm2452_vm7 = vcmp.gt.f32.partialorder %v2396_v23, 0.0  ;;  %v2468_v20 = vmul.f32 0.1, %v2396_v23  ;;  %v2399_v21 = vadd.f32 %v2722_v60, %v4857_v59  ;;  %v2390_v44 = vpop.f32.mrb[3].mxu1 }
 0x322   : > { %vm2450_vm8 = vcmp.gt.f32.partialorder %v2388_v24, 0.0  ;;  %v2466_v45 = vmul.f32 0.1, %v2388_v24  ;;  %v2391_v53 = vadd.f32 %v4857_v59, %v2390_v44 }
 0x323   : > { %v2484_v25 = vsel %vm2452_vm7, %v2396_v23, %v2468_v20  ;;  %vm2453_vm13 = vcmp.gt.f32.partialorder %v2399_v21, 0.0  ;;  %v2469_v52 = vmul.f32 0.1, %v2399_v21 }
 0x324   : > { %2500 = vst.msk [vmem:[%s4864_s18 + $0x10] sm:$0xff] %vm928_vm3, %v2484_v25  ;;  %v2482_v14 = vsel %vm2450_vm8, %v2388_v24, %v2466_v45  ;;  %vm2451_vm9 = vcmp.gt.f32.partialorder %v2391_v53, 0.0  ;;  %v2467_v28 = vmul.f32 0.1, %v2391_v53 }
 0x325   : > { %2498 = vst.msk [vmem:[%s4864_s18] sm:$0xff] %vm928_vm3, %v2482_v14  ;;  %v2485_v32 = vsel %vm2453_vm13, %v2399_v21, %v2469_v52 }
 0x326   : > { %2501 = vst.msk [vmem:[%s4864_s18 + $0x18] sm:$0xff] %vm928_vm3, %v2485_v32  ;;  %v2483_v42 = vsel %vm2451_vm9, %v2391_v53, %v2467_v28 }
 0x327   : > { %2499 = vst.msk [vmem:[%s4864_s18 + $0x8] sm:$0xff] %vm928_vm3, %v2483_v42 }
 0x33e   : > { %v2725_v36 = vpop.f32.mrb[4].mxu1 }
 0x33f   : > { %v2412_v6 = vadd.f32 %v2725_v36, %v4857_v59  ;;  %v2403_v54 = vpop.f32.mrb[5].mxu1 }
 0x340   : > { %v2404_v1 = vadd.f32 %v4857_v59, %v2403_v54  ;;  %v2726_v31 = vpop.f32.mrb[6].mxu1 }
 0x341   : > { %vm2456_vm10 = vcmp.gt.f32.partialorder %v2412_v6, 0.0  ;;  %v2472_v35 = vmul.f32 0.1, %v2412_v6  ;;  %v2415_v12 = vadd.f32 %v2726_v31, %v4857_v59  ;;  %v2406_v18 = vpop.f32.mrb[7].mxu1 }
 0x342   : > { %vm2454_vm2 = vcmp.gt.f32.partialorder %v2404_v1, 0.0  ;;  %v2470_v17 = vmul.f32 0.1, %v2404_v1  ;;  %v2407_v0 = vadd.f32 %v4857_v59, %v2406_v18 }
 0x343   : > { %v2488_v43 = vsel %vm2456_vm10, %v2412_v6, %v2472_v35  ;;  %vm2457_vm11 = vcmp.gt.f32.partialorder %v2415_v12, 0.0  ;;  %v2473_v4 = vmul.f32 0.1, %v2415_v12 }
 0x344   : > { %2504 = vst.msk [vmem:[%s4864_s18 + $0x30] sm:$0xff] %vm928_vm3, %v2488_v43  ;;  %v2486_v39 = vsel %vm2454_vm2, %v2404_v1, %v2470_v17  ;;  %vm2455_vm14 = vcmp.gt.f32.partialorder %v2407_v0, 0.0  ;;  %v2471_v48 = vmul.f32 0.1, %v2407_v0 }
 0x345   : > { %2502 = vst.msk [vmem:[%s4864_s18 + $0x20] sm:$0xff] %vm928_vm3, %v2486_v39  ;;  %v2489_v3 = vsel %vm2457_vm11, %v2415_v12, %v2473_v4 }
 0x346   : > { %2505 = vst.msk [vmem:[%s4864_s18 + $0x38] sm:$0xff] %vm928_vm3, %v2489_v3  ;;  %v2487_v33 = vsel %vm2455_vm14, %v2407_v0, %v2471_v48 }
 0x347   : > { %2503 = vst.msk [vmem:[%s4864_s18 + $0x28] sm:$0xff] %vm928_vm3, %v2487_v33 }
 0x35f   : > { %v2729_v19 = vpop.f32.mrb[8].mxu1 }
 0x360   : > { %v2428_v22 = vadd.f32 %v2729_v19, %v4857_v59  ;;  %v2419_v15 = vpop.f32.mrb[9].mxu1 }
 0x361   : > { %v2420_v10 = vadd.f32 %v4857_v59, %v2419_v15  ;;  %v2730_v40 = vpop.f32.mrb[10].mxu1 }
 0x362   : > { %vm2460_vm15 = vcmp.gt.f32.partialorder %v2428_v22, 0.0  ;;  %v2476_v2 = vmul.f32 0.1, %v2428_v22  ;;  %v2431_v13 = vadd.f32 %v2730_v40, %v4857_v59  ;;  %v2422_v7 = vpop.f32.mrb[11].mxu1 }
 0x363   : > { %vm2458_vm0 = vcmp.gt.f32.partialorder %v2420_v10, 0.0  ;;  %v2474_v30 = vmul.f32 0.1, %v2420_v10  ;;  %v2423_v46 = vadd.f32 %v4857_v59, %v2422_v7 }
 0x364   : > { %v2492_v61 = vsel %vm2460_vm15, %v2428_v22, %v2476_v2  ;;  %vm2461_vm4 = vcmp.gt.f32.partialorder %v2431_v13, 0.0  ;;  %v2477_v41 = vmul.f32 0.1, %v2431_v13 }
 0x365   : > { %2508 = vst.msk [vmem:[%s4864_s18 + $0x50] sm:$0xff] %vm928_vm3, %v2492_v61  ;;  %v2490_v37 = vsel %vm2458_vm0, %v2420_v10, %v2474_v30  ;;  %vm2459_vm5 = vcmp.gt.f32.partialorder %v2423_v46, 0.0  ;;  %v2475_v62 = vmul.f32 0.1, %v2423_v46 }
 0x366   : > { %2506 = vst.msk [vmem:[%s4864_s18 + $0x40] sm:$0xff] %vm928_vm3, %v2490_v37  ;;  %v2493_v5 = vsel %vm2461_vm4, %v2431_v13, %v2477_v41 }
 0x367   : > { %2509 = vst.msk [vmem:[%s4864_s18 + $0x58] sm:$0xff] %vm928_vm3, %v2493_v5  ;;  %v2491_v51 = vsel %vm2459_vm5, %v2423_v46, %v2475_v62 }
 0x368   : > { %2507 = vst.msk [vmem:[%s4864_s18 + $0x48] sm:$0xff] %vm928_vm3, %v2491_v51 }
 0x377   : > { %v2733_v63 = vpop.f32.mrb[12].mxu1 }
 0x378   : > { %v2444_v16 = vadd.f32 %v2733_v63, %v4857_v59  ;;  %v2435_v38 = vpop.f32.mrb[13].mxu1 }
 0x379   : > { %v2436_v34 = vadd.f32 %v4857_v59, %v2435_v38  ;;  %v2734_v8 = vpop.f32.mrb[14].mxu1 }
 0x37a   : > { %vm2464_vm6 = vcmp.gt.f32.partialorder %v2444_v16, 0.0  ;;  %v2480_v11 = vmul.f32 0.1, %v2444_v16  ;;  %v2447_v26 = vadd.f32 %v2734_v8, %v4857_v59  ;;  %v2438_v29 = vpop.f32.mrb[15].mxu1 }
 0x37b   : > { %vm2462_vm1 = vcmp.gt.f32.partialorder %v2436_v34, 0.0  ;;  %v2478_v50 = vmul.f32 0.1, %v2436_v34  ;;  %v2439_v56 = vadd.f32 %v4857_v59, %v2438_v29 }
 0x37c   : > { %v2496_v9 = vsel %vm2464_vm6, %v2444_v16, %v2480_v11  ;;  %vm2465_vm12 = vcmp.gt.f32.partialorder %v2447_v26, 0.0  ;;  %v2481_v57 = vmul.f32 0.1, %v2447_v26 }
 0x37d   : > { %2512 = vst.msk [vmem:[%s4864_s18 + $0x70] sm:$0xff] %vm928_vm3, %v2496_v9  ;;  %v2494_v55 = vsel %vm2462_vm1, %v2436_v34, %v2478_v50  ;;  %vm2463_vm7 = vcmp.gt.f32.partialorder %v2439_v56, 0.0  ;;  %v2479_v27 = vmul.f32 0.1, %v2439_v56 }
 0x37e   : > { %2510 = vst.msk [vmem:[%s4864_s18 + $0x60] sm:$0xff] %vm928_vm3, %v2494_v55  ;;  %v2497_v49 = vsel %vm2465_vm12, %v2447_v26, %v2481_v57 }
 0x37f   : > { %2513 = vst.msk [vmem:[%s4864_s18 + $0x78] sm:$0xff] %vm928_vm3, %v2497_v49  ;;  %v2495_v47 = vsel %vm2463_vm7, %v2439_v56, %v2479_v27 }
 0x380   : > { %2511 = vst.msk [vmem:[%s4864_s18 + $0x68] sm:$0xff] %vm928_vm3, %v2495_v47 }
 0x381 PF: > { %s15_s22 = sadd.s32 1, %s3561_s22   ;;  %s4989_s18 = smov %s3553_s20 }
 0x382   : > { %p12_p7 = scmp.ge.s32.totalorder %s15_s22, 6   ;;  %s4990_s19 = smov %s3557_s21 }
 0x383   : > { %s4991_s20 = smov %s4994_s23  ;;  %s4992_s21 = smov %s4998_s24 }
 0x384   :  { %14 = sbr.rel (!%p12_p7) target bundleno = 3 (0x3), region = 73 }

</bundles_post_ra>
